<compile_context>
chip_gen: v7x
topology: tpu7x:2x2x1
jax: 0.10.0
libtpu: 0.0.40
codegen_flags: <defaults>
</compile_context>

<pallas_src>
import jax
import jax.numpy as jnp
from jax.experimental import pallas as pl
from jax.experimental.pallas import tpu as pltpu


def _encoder_ocd_kernel(x_ref, w1_ref, b1_ref, w2_ref, b2_ref,
                        wo1_ref, bo1_ref, wo2_ref, bo2_ref, wo3_ref,
                        out_ref, acc_ref):
    # x_ref   : [Tp, B, C]     bf16   per-plane input slices (this plane tile)
    # w1_ref  : [Tp, H1, C]    bf16   H1 = out_size*4
    # b1_ref  : [Pp, H1]       f32    resident (full, padded planes = 0)
    # w2_ref  : [Tp, O, H1]    bf16   O = out_size
    # b2_ref  : [Pp, O]        f32    resident (full)
    # wo1_ref : [Tp*O, D1]     bf16   flattened ocd_linear1 rows (p*O+o ordering)
    # bo1_ref : [1, D1]        f32    resident
    # wo2_ref : [D1, D2]       bf16   resident
    # bo2_ref : [1, D2]        f32    resident
    # wo3_ref : [D2, D3]       bf16   resident
    # out_ref : [B, D3]        f32
    # acc_ref : [B, D1]        f32    running ocd_linear1 partial sum (scratch)
    p = pl.program_id(0)
    tp, b, _ = x_ref.shape
    o = w2_ref.shape[1]

    @pl.when(p == 0)
    def _init():
        acc_ref[...] = jnp.zeros_like(acc_ref)

    x = x_ref[...]                                               # [Tp, B, C] bf16

    # ---- per-plane feature MLPs, batched over the plane tile ----
    h = jnp.einsum('pbc,phc->pbh', x, w1_ref[...],
                   preferred_element_type=jnp.float32)           # [Tp, B, H1] f32
    b1 = b1_ref[pl.ds(p * tp, tp), :]                            # [Tp, H1]
    h = jnp.maximum(h + b1[:, None, :], 0.0).astype(x.dtype)     # ReLU -> bf16

    f = jnp.einsum('pbh,poh->bpo', h, w2_ref[...],
                   preferred_element_type=jnp.float32)           # [B, Tp, O] f32
    b2 = b2_ref[pl.ds(p * tp, tp), :]                            # [Tp, O]
    f = jnp.maximum(f + b2[None, :, :], 0.0).astype(x.dtype)     # ReLU -> bf16

    # ---- fused plane-sum + ocd_linear1 contribution (single MXU dot, K=Tp*O) ----
    # flat[b, p*O + o] = f[b, p, o]; wo1_ref rows use the same p*O+o ordering.
    f_flat = f.reshape(b, tp * o)                                # [B, Tp*O]
    acc_ref[...] += jnp.dot(f_flat, wo1_ref[...],
                            preferred_element_type=jnp.float32)  # [B, D1]

    # ---- finalize on the last plane tile: bias+ReLU, 512->256 ReLU, 256->6 ReLU6 ----
    @pl.when(p == pl.num_programs(0) - 1)
    def _finalize():
        y = jnp.maximum(acc_ref[...] + bo1_ref[...], 0.0)        # [B, D1]
        y = jnp.dot(y.astype(wo2_ref.dtype), wo2_ref[...],
                    preferred_element_type=jnp.float32) + bo2_ref[...]
        y = jnp.maximum(y, 0.0)                                  # [B, D2]
        y = jnp.dot(y.astype(wo3_ref.dtype), wo3_ref[...],
                    preferred_element_type=jnp.float32)          # [B, D3]
        out_ref[...] = jnp.clip(y, 0.0, 6.0)


def _plane_tiling(P, max_tp):
    """Pick plane-tile size tp and padded plane count P_pad (P_pad % tp == 0).

    Prefers fewest grid steps, then least padding, then the largest tile.
    Guards against the Tp=1 cliff when P has no convenient divisor (pads with
    zeroed planes instead)."""
    max_tp = max(1, min(max_tp, P))
    lo = max(1, (max_tp + 1) // 2)
    best = None
    for t in range(lo, max_tp + 1):
        steps = -(-P // t)
        p_pad = steps * t
        key = (steps, p_pad, -t)
        if best is None or key < best[0]:
            best = (key, t, p_pad)
    return best[1], best[2]


def pack_params(params, out_size=8, max_tp=64):
    """One-time host-side packing: bf16 casts, layout transposes, plane padding.

    Done once per model, NOT on the per-call path (the raw-param prep otherwise
    moves more HBM bytes than the kernel itself)."""
    P, H1, C = params['w1'].shape
    O = out_size
    D1 = params['wo1'].shape[0]
    D2 = params['wo2'].shape[0]
    D3 = params['wo3'].shape[0]
    tp, P_pad = _plane_tiling(P, max_tp)
    cdt = jnp.bfloat16

    def pad_planes(a):
        if P_pad == P:
            return a
        pad = [(0, P_pad - P)] + [(0, 0)] * (a.ndim - 1)
        return jnp.pad(a, pad)  # zero-padded planes contribute exactly 0

    w1 = pad_planes(params['w1']).astype(cdt)                    # [Pp, H1, C]
    b1 = pad_planes(params['b1']).astype(jnp.float32)            # [Pp, H1]
    w2 = pad_planes(params['w2']).astype(cdt)                    # [Pp, O, H1]
    b2 = pad_planes(params['b2']).astype(jnp.float32)            # [Pp, O]
    # ocd_linear1 weight [D1, P*O] -> [P, O, D1] (PyTorch flatten order p*O+o),
    # zero-pad planes, then flatten rows -> [Pp*O, D1]
    wo1 = jnp.transpose(params['wo1'].reshape(D1, P, O), (1, 2, 0))
    wo1 = pad_planes(wo1).reshape(P_pad * O, D1).astype(cdt)     # [Pp*O, D1]
    bo1 = params['bo1'].reshape(1, D1).astype(jnp.float32)
    wo2 = jnp.transpose(params['wo2'], (1, 0)).astype(cdt)       # [D1, D2]
    bo2 = params['bo2'].reshape(1, D2).astype(jnp.float32)
    wo3 = jnp.transpose(params['wo3'], (1, 0)).astype(cdt)       # [D2, D3]

    packed = dict(w1=w1, b1=b1, w2=w2, b2=b2, wo1=wo1, bo1=bo1,
                  wo2=wo2, bo2=bo2, wo3=wo3)
    meta = dict(P=P, P_pad=P_pad, tp=tp, out_size=O, in_size=C,
                dims=(D1, D2, D3))
    return packed, meta


def encoder_ocd_forward(x, packed, meta):
    """x: [B, C, P] float32 (PyTorch layout: batch, feature, inplanes). Returns [B, 6]."""
    B, C, P = x.shape
    assert P == meta['P'] and C == meta['in_size']
    tp, P_pad = meta['tp'], meta['P_pad']
    O = meta['out_size']
    H1 = O * 4
    D1, D2, D3 = meta['dims']

    # activations only: [B, C, P] -> [Pp, B, C] bf16 (weights were packed once)
    x_p = jnp.transpose(x, (2, 0, 1)).astype(jnp.bfloat16)
    if P_pad != P:
        x_p = jnp.pad(x_p, ((0, P_pad - P), (0, 0), (0, 0)))

    grid = (P_pad // tp,)
    plane3 = lambda i: (i, 0, 0)     # tiled along planes
    fixed2 = lambda i: (0, 0)        # resident (same block every step -> no re-DMA)

    grid_spec = pltpu.PrefetchScalarGridSpec(
        num_scalar_prefetch=0,
        grid=grid,
        in_specs=[
            pl.BlockSpec((tp, B, C), plane3),               # x
            pl.BlockSpec((tp, H1, C), plane3),              # w1
            pl.BlockSpec((P_pad, H1), fixed2),              # b1 (resident full)
            pl.BlockSpec((tp, O, H1), plane3),              # w2
            pl.BlockSpec((P_pad, O), fixed2),               # b2 (resident full)
            pl.BlockSpec((tp * O, D1), lambda i: (i, 0)),   # wo1 flat rows
            pl.BlockSpec((1, D1), fixed2),                  # bo1
            pl.BlockSpec((D1, D2), fixed2),                 # wo2
            pl.BlockSpec((1, D2), fixed2),                  # bo2
            pl.BlockSpec((D2, D3), fixed2),                 # wo3
        ],
        out_specs=pl.BlockSpec((B, D3), fixed2),
        scratch_shapes=[pltpu.VMEM((B, D1), jnp.float32)],
    )

    return pl.pallas_call(
        _encoder_ocd_kernel,
        out_shape=jax.ShapeDtypeStruct((B, D3), jnp.float32),
        grid_spec=grid_spec,
        compiler_params=pltpu.CompilerParams(
            dimension_semantics=("arbitrary",)),   # plane axis is a reduction
    )(x_p, packed['w1'], packed['b1'], packed['w2'], packed['b2'],
      packed['wo1'], packed['bo1'], packed['wo2'], packed['bo2'], packed['wo3'])


def init_params(key, inplanes, out_size=8, in_size=512):
    H1 = out_size * 4
    D0, D1, D2, D3 = out_size * inplanes, 512, 256, 6
    ks = jax.random.split(key, 9)
    s = 0.05
    return {
        'w1':  s * jax.random.normal(ks[0], (inplanes, H1, in_size), jnp.float32),
        'b1':  s * jax.random.normal(ks[1], (inplanes, H1), jnp.float32),
        'w2':  s * jax.random.normal(ks[2], (inplanes, out_size, H1), jnp.float32),
        'b2':  s * jax.random.normal(ks[3], (inplanes, out_size), jnp.float32),
        'wo1': s * jax.random.normal(ks[4], (D1, D0), jnp.float32),
        'bo1': s * jax.random.normal(ks[5], (D1,), jnp.float32),
        'wo2': s * jax.random.normal(ks[6], (D2, D1), jnp.float32),
        'bo2': s * jax.random.normal(ks[7], (D2,), jnp.float32),
        'wo3': s * jax.random.normal(ks[8], (D3, D2), jnp.float32),
    }


def _reference_forward(x, params, out_size=8):
    """Pure-JAX float32 reference mirroring the PyTorch forward."""
    B, C, P = x.shape
    feats = []
    for i in range(P):
        xi = x[:, :, i]                                          # [B, 512]
        h = jnp.maximum(xi @ params['w1'][i].T + params['b1'][i], 0.0)
        f = jnp.maximum(h @ params['w2'][i].T + params['b2'][i], 0.0)
        feats.append(f[:, None, :])                              # [B, 1, O]
    y = jnp.concatenate(feats, axis=1).reshape(B, -1)            # [B, P*O]
    y = jnp.maximum(y @ params['wo1'].T + params['bo1'], 0.0)
    y = jnp.maximum(y @ params['wo2'].T + params['bo2'], 0.0)
    y = y @ params['wo3'].T
    return jnp.clip(y, 0.0, 6.0)


if __name__ == "__main__":
    B = 2
    INPLANES = 32       # small test size; module default is 196
    IN_SIZE = 512       # hard-coded in Encoder_Feature_Linear
    OUT_SIZE = 8

    key = jax.random.PRNGKey(0)
    kx, kp = jax.random.split(key)
    x = jax.random.normal(kx, (B, IN_SIZE, INPLANES), jnp.float32)
    params = init_params(kp, INPLANES, OUT_SIZE, IN_SIZE)

    # Pack once (bf16 casts / layout prep hoisted out of the per-call path).
    # max_tp=8 -> Tp=8, 4 grid steps: exercises the accumulate-over-planes pipeline.
    packed, meta = pack_params(params, out_size=OUT_SIZE, max_tp=8)
    out = jax.block_until_ready(encoder_ocd_forward(x, packed, meta))
    ref = _reference_forward(x, params, OUT_SIZE)
    assert out.shape == (B, 6)
    # bf16 streaming with f32 accumulation -> loose tolerance vs the f32 reference.
    assert jnp.allclose(out, ref, atol=2e-2, rtol=1e-1), "mismatch vs reference"

    # Ragged plane count (no divisor <= max_tp except 1) -> zero-padded planes path.
    INPLANES2 = 13
    x2 = jax.random.normal(jax.random.PRNGKey(2), (B, IN_SIZE, INPLANES2), jnp.float32)
    params2 = init_params(jax.random.PRNGKey(3), INPLANES2, OUT_SIZE, IN_SIZE)
    packed2, meta2 = pack_params(params2, out_size=OUT_SIZE, max_tp=8)
    out2 = jax.block_until_ready(encoder_ocd_forward(x2, packed2, meta2))
    ref2 = _reference_forward(x2, params2, OUT_SIZE)
    assert jnp.allclose(out2, ref2, atol=2e-2, rtol=1e-1), "mismatch vs reference (padded)"

    print("KERNEL_OK")
</pallas_src>

<mosaic_0001>
module attributes {stable_mosaic.version = 11 : i64} {
  func.func @_encoder_ocd_kernel(%arg0: i32, %arg1: memref<8x2x512xbf16, #tpu.memory_space<vmem>>, %arg2: memref<8x32x512xbf16, #tpu.memory_space<vmem>>, %arg3: memref<32x32xf32, #tpu.memory_space<vmem>>, %arg4: memref<8x8x32xbf16, #tpu.memory_space<vmem>>, %arg5: memref<32x8xf32, #tpu.memory_space<vmem>>, %arg6: memref<64x512xbf16, #tpu.memory_space<vmem>>, %arg7: memref<1x512xf32, #tpu.memory_space<vmem>>, %arg8: memref<512x256xbf16, #tpu.memory_space<vmem>>, %arg9: memref<1x256xf32, #tpu.memory_space<vmem>>, %arg10: memref<256x6xbf16, #tpu.memory_space<vmem>>, %arg11: memref<2x6xf32, #tpu.memory_space<vmem>>, %arg12: memref<2x512xf32, #tpu.memory_space<vmem>>) attributes {dimension_semantics = [#tpu.dimension_semantics<arbitrary>], iteration_bounds = array<i64: 4>, scalar_prefetch = 0 : i64, scratch_operands = 1 : i64, tpu.core_type = #tpu.core_type<tc>, window_params = [{transform_indices = @transform_0, window_bounds = array<i64: 8, 2, 512>}, {transform_indices = @transform_1, window_bounds = array<i64: 8, 32, 512>}, {pipeline_mode = #tpu.pipeline_mode<synchronous>, transform_indices = @transform_2, window_bounds = array<i64: 32, 32>}, {transform_indices = @transform_3, window_bounds = array<i64: 8, 8, 32>}, {pipeline_mode = #tpu.pipeline_mode<synchronous>, transform_indices = @transform_4, window_bounds = array<i64: 32, 8>}, {transform_indices = @transform_5, window_bounds = array<i64: 64, 512>}, {pipeline_mode = #tpu.pipeline_mode<synchronous>, transform_indices = @transform_6, window_bounds = array<i64: 1, 512>}, {pipeline_mode = #tpu.pipeline_mode<synchronous>, transform_indices = @transform_7, window_bounds = array<i64: 512, 256>}, {pipeline_mode = #tpu.pipeline_mode<synchronous>, transform_indices = @transform_8, window_bounds = array<i64: 1, 256>}, {pipeline_mode = #tpu.pipeline_mode<synchronous>, transform_indices = @transform_9, window_bounds = array<i64: 256, 6>}, {pipeline_mode = #tpu.pipeline_mode<synchronous>, transform_indices = @transform_10, window_bounds = array<i64: 2, 6>}]} {
    %c0_i32 = arith.constant 0 : i32
    %0 = arith.cmpi eq, %arg0, %c0_i32 : i32
    %1 = arith.extui %0 : i1 to i32
    %c0_i32_0 = arith.constant 0 : i32
    %2 = arith.cmpi ne, %1, %c0_i32_0 : i32
    scf.if %2 {
      %cst_23 = arith.constant 0.000000e+00 : f32
      %36 = vector.broadcast %cst_23 : f32 to vector<2x512xf32>
      %c0_24 = arith.constant 0 : index
      %c0_25 = arith.constant 0 : index
      %37 = vector.load %arg12[%c0_24, %c0_25] : memref<2x512xf32, #tpu.memory_space<vmem>>, vector<2x512xf32>
      tpu.vector_store %arg12[%c0_24, %c0_25], %36 {strides = array<i32>} : memref<2x512xf32, #tpu.memory_space<vmem>>, vector<2x512xf32>,
    } else {
    }
    %c0 = arith.constant 0 : index
    %c0_1 = arith.constant 0 : index
    %c0_2 = arith.constant 0 : index
    %3 = vector.load %arg1[%c0, %c0_1, %c0_2] : memref<8x2x512xbf16, #tpu.memory_space<vmem>>, vector<8x2x512xbf16>
    %c0_3 = arith.constant 0 : index
    %c0_4 = arith.constant 0 : index
    %c0_5 = arith.constant 0 : index
    %4 = vector.load %arg2[%c0_3, %c0_4, %c0_5] : memref<8x32x512xbf16, #tpu.memory_space<vmem>>, vector<8x32x512xbf16>
    "tpu.trace_start"() <{level = 10 : i32, message = "pbc,phc->pbh"}> : () -> ()
    %cst = arith.constant dense<0.000000e+00> : vector<8x2x32xf32>
    %5 = tpu.matmul %3, %4, %cst {dimension_numbers = #tpu.dot_dimension_numbers<[2], [2], [1], [1], [0, 0, 0, 1, 1, 1], [0], [0]>} : vector<8x2x512xbf16>, vector<8x32x512xbf16>, vector<8x2x32xf32> -> vector<8x2x32xf32>
    "tpu.trace_stop"() : () -> ()
    %c8_i32 = arith.constant 8 : i32
    %6 = arith.muli %arg0, %c8_i32 : i32
    %7 = arith.index_cast %6 : i32 to index
    %c0_6 = arith.constant 0 : index
    %8 = vector.load %arg3[%7, %c0_6] : memref<32x32xf32, #tpu.memory_space<vmem>>, vector<8x32xf32>
    %9 = vector.shape_cast %8 : vector<8x32xf32> to vector<8x1x32xf32>
    %10 = vector.broadcast %9 : vector<8x1x32xf32> to vector<8x2x32xf32>
    %11 = arith.addf %5, %10 : vector<8x2x32xf32>
    %cst_7 = arith.constant 0.000000e+00 : f32
    %12 = vector.broadcast %cst_7 : f32 to vector<8x2x32xf32>
    %13 = arith.maximumf %11, %12 : vector<8x2x32xf32>
    %14 = arith.truncf %13 : vector<8x2x32xf32> to vector<8x2x32xbf16>
    %c0_8 = arith.constant 0 : index
    %c0_9 = arith.constant 0 : index
    %c0_10 = arith.constant 0 : index
    %15 = vector.load %arg4[%c0_8, %c0_9, %c0_10] : memref<8x8x32xbf16, #tpu.memory_space<vmem>>, vector<8x8x32xbf16>
    "tpu.trace_start"() <{level = 10 : i32, message = "pbh,poh->bpo"}> : () -> ()
    %cst_11 = arith.constant dense<0.000000e+00> : vector<8x8x2xf32>
    %16 = tpu.matmul %15, %14, %cst_11 {dimension_numbers = #tpu.dot_dimension_numbers<[2], [2], [1], [1], [0, 0, 0, 1, 1, 1], [0], [0]>} : vector<8x8x32xbf16>, vector<8x2x32xbf16>, vector<8x8x2xf32> -> vector<8x8x2xf32>
    %17 = tpu.transpose %16, [2, 0, 1] : vector<8x8x2xf32> -> vector<2x8x8xf32>
    "tpu.trace_stop"() : () -> ()
    %c8_i32_12 = arith.constant 8 : i32
    %18 = arith.muli %arg0, %c8_i32_12 : i32
    %19 = arith.index_cast %18 : i32 to index
    %c0_13 = arith.constant 0 : index
    %20 = vector.load %arg5[%19, %c0_13] : memref<32x8xf32, #tpu.memory_space<vmem>>, vector<8x8xf32>
    %21 = vector.shape_cast %20 : vector<8x8xf32> to vector<1x8x8xf32>
    %22 = vector.broadcast %21 : vector<1x8x8xf32> to vector<2x8x8xf32>
    %23 = arith.addf %17, %22 : vector<2x8x8xf32>
    %cst_14 = arith.constant 0.000000e+00 : f32
    %24 = vector.broadcast %cst_14 : f32 to vector<2x8x8xf32>
    %25 = arith.maximumf %23, %24 : vector<2x8x8xf32>
    %26 = arith.truncf %25 : vector<2x8x8xf32> to vector<2x8x8xbf16>
    %27 = vector.shape_cast %26 : vector<2x8x8xbf16> to vector<2x64xbf16>
    %c0_15 = arith.constant 0 : index
    %c0_16 = arith.constant 0 : index
    %28 = vector.load %arg12[%c0_15, %c0_16] : memref<2x512xf32, #tpu.memory_space<vmem>>, vector<2x512xf32>
    %c0_17 = arith.constant 0 : index
    %c0_18 = arith.constant 0 : index
    %29 = vector.load %arg6[%c0_17, %c0_18] : memref<64x512xbf16, #tpu.memory_space<vmem>>, vector<64x512xbf16>
    %cst_19 = arith.constant dense<0.000000e+00> : vector<2x512xf32>
    %30 = tpu.matmul %27, %29, %cst_19 {dimension_numbers = #tpu.dot_dimension_numbers<[1], [0], [0], [1], [0, 0, 1, 1], [], []>} : vector<2x64xbf16>, vector<64x512xbf16>, vector<2x512xf32> -> vector<2x512xf32>
    %31 = arith.addf %28, %30 : vector<2x512xf32>
    %c0_20 = arith.constant 0 : index
    %c0_21 = arith.constant 0 : index
    %32 = vector.load %arg12[%c0_20, %c0_21] : memref<2x512xf32, #tpu.memory_space<vmem>>, vector<2x512xf32>
    tpu.vector_store %arg12[%c0_20, %c0_21], %31 {strides = array<i32>} : memref<2x512xf32, #tpu.memory_space<vmem>>, vector<2x512xf32>,
    %c3_i32 = arith.constant 3 : i32
    %33 = arith.cmpi eq, %arg0, %c3_i32 : i32
    %34 = arith.extui %33 : i1 to i32
    %c0_i32_22 = arith.constant 0 : i32
    %35 = arith.cmpi ne, %34, %c0_i32_22 : i32
    scf.if %35 {
      %c0_23 = arith.constant 0 : index
      %c0_24 = arith.constant 0 : index
      %36 = vector.load %arg12[%c0_23, %c0_24] : memref<2x512xf32, #tpu.memory_space<vmem>>, vector<2x512xf32>
      %c0_25 = arith.constant 0 : index
      %c0_26 = arith.constant 0 : index
      %37 = vector.load %arg7[%c0_25, %c0_26] : memref<1x512xf32, #tpu.memory_space<vmem>>, vector<1x512xf32>
      %38 = vector.broadcast %37 : vector<1x512xf32> to vector<2x512xf32>
      %39 = arith.addf %36, %38 : vector<2x512xf32>
      %cst_27 = arith.constant 0.000000e+00 : f32
      %40 = vector.broadcast %cst_27 : f32 to vector<2x512xf32>
      %41 = arith.maximumf %39, %40 : vector<2x512xf32>
      %42 = arith.truncf %41 : vector<2x512xf32> to vector<2x512xbf16>
      %c0_28 = arith.constant 0 : index
      %c0_29 = arith.constant 0 : index
      %43 = vector.load %arg8[%c0_28, %c0_29] : memref<512x256xbf16, #tpu.memory_space<vmem>>, vector<512x256xbf16>
      %cst_30 = arith.constant dense<0.000000e+00> : vector<2x256xf32>
      %44 = tpu.matmul %42, %43, %cst_30 {dimension_numbers = #tpu.dot_dimension_numbers<[1], [0], [0], [1], [0, 0, 1, 1], [], []>} : vector<2x512xbf16>, vector<512x256xbf16>, vector<2x256xf32> -> vector<2x256xf32>
      %c0_31 = arith.constant 0 : index
      %c0_32 = arith.constant 0 : index
      %45 = vector.load %arg9[%c0_31, %c0_32] : memref<1x256xf32, #tpu.memory_space<vmem>>, vector<1x256xf32>
      %46 = vector.broadcast %45 : vector<1x256xf32> to vector<2x256xf32>
      %47 = arith.addf %44, %46 : vector<2x256xf32>
      %cst_33 = arith.constant 0.000000e+00 : f32
      %48 = vector.broadcast %cst_33 : f32 to vector<2x256xf32>
      %49 = arith.maximumf %47, %48 : vector<2x256xf32>
      %50 = arith.truncf %49 : vector<2x256xf32> to vector<2x256xbf16>
      %c0_34 = arith.constant 0 : index
      %c0_35 = arith.constant 0 : index
      %51 = vector.load %arg10[%c0_34, %c0_35] : memref<256x6xbf16, #tpu.memory_space<vmem>>, vector<256x6xbf16>
      %cst_36 = arith.constant dense<0.000000e+00> : vector<2x6xf32>
      %52 = tpu.matmul %50, %51, %cst_36 {dimension_numbers = #tpu.dot_dimension_numbers<[1], [0], [0], [1], [0, 0, 1, 1], [], []>} : vector<2x256xbf16>, vector<256x6xbf16>, vector<2x6xf32> -> vector<2x6xf32>
      %cst_37 = arith.constant 0.000000e+00 : f32
      %cst_38 = arith.constant 6.000000e+00 : f32
      %53 = vector.broadcast %cst_37 : f32 to vector<2x6xf32>
      %54 = arith.maximumf %53, %52 : vector<2x6xf32>
      %55 = vector.broadcast %cst_38 : f32 to vector<2x6xf32>
      %56 = arith.minimumf %55, %54 : vector<2x6xf32>
      %c0_39 = arith.constant 0 : index
      %c0_40 = arith.constant 0 : index
      %57 = vector.load %arg11[%c0_39, %c0_40] : memref<2x6xf32, #tpu.memory_space<vmem>>, vector<2x6xf32>
      tpu.vector_store %arg11[%c0_39, %c0_40], %56 {strides = array<i32>} : memref<2x6xf32, #tpu.memory_space<vmem>>, vector<2x6xf32>,
    } else {
    }
    return
  }
  func.func @transform_0(%arg0: i32) -> (i32, i32, i32) {
    %c0_i32 = arith.constant 0 : i32
    %c0_i32_0 = arith.constant 0 : i32
    %c0_i32_1 = arith.constant 0 : i32
    return %arg0, %c0_i32, %c0_i32_0 : i32, i32, i32
  }
  func.func @transform_1(%arg0: i32) -> (i32, i32, i32) {
    %c0_i32 = arith.constant 0 : i32
    %c0_i32_0 = arith.constant 0 : i32
    %c0_i32_1 = arith.constant 0 : i32
    return %arg0, %c0_i32, %c0_i32_0 : i32, i32, i32
  }
  func.func @transform_2(%arg0: i32) -> (i32, i32) {
    %c0_i32 = arith.constant 0 : i32
    %c0_i32_0 = arith.constant 0 : i32
    %c0_i32_1 = arith.constant 0 : i32
    return %c0_i32, %c0_i32_0 : i32, i32
  }
  func.func @transform_3(%arg0: i32) -> (i32, i32, i32) {
    %c0_i32 = arith.constant 0 : i32
    %c0_i32_0 = arith.constant 0 : i32
    %c0_i32_1 = arith.constant 0 : i32
    return %arg0, %c0_i32, %c0_i32_0 : i32, i32, i32
  }
  func.func @transform_4(%arg0: i32) -> (i32, i32) {
    %c0_i32 = arith.constant 0 : i32
    %c0_i32_0 = arith.constant 0 : i32
    %c0_i32_1 = arith.constant 0 : i32
    return %c0_i32, %c0_i32_0 : i32, i32
  }
  func.func @transform_5(%arg0: i32) -> (i32, i32) {
    %c0_i32 = arith.constant 0 : i32
    %c0_i32_0 = arith.constant 0 : i32
    return %arg0, %c0_i32 : i32, i32
  }
  func.func @transform_6(%arg0: i32) -> (i32, i32) {
    %c0_i32 = arith.constant 0 : i32
    %c0_i32_0 = arith.constant 0 : i32
    %c0_i32_1 = arith.constant 0 : i32
    return %c0_i32, %c0_i32_0 : i32, i32
  }
  func.func @transform_7(%arg0: i32) -> (i32, i32) {
    %c0_i32 = arith.constant 0 : i32
    %c0_i32_0 = arith.constant 0 : i32
    %c0_i32_1 = arith.constant 0 : i32
    return %c0_i32, %c0_i32_0 : i32, i32
  }
  func.func @transform_8(%arg0: i32) -> (i32, i32) {
    %c0_i32 = arith.constant 0 : i32
    %c0_i32_0 = arith.constant 0 : i32
    %c0_i32_1 = arith.constant 0 : i32
    return %c0_i32, %c0_i32_0 : i32, i32
  }
  func.func @transform_9(%arg0: i32) -> (i32, i32) {
    %c0_i32 = arith.constant 0 : i32
    %c0_i32_0 = arith.constant 0 : i32
    %c0_i32_1 = arith.constant 0 : i32
    return %c0_i32, %c0_i32_0 : i32, i32
  }
  func.func @transform_10(%arg0: i32) -> (i32, i32) {
    %c0_i32 = arith.constant 0 : i32
    %c0_i32_0 = arith.constant 0 : i32
    %c0_i32_1 = arith.constant 0 : i32
    return %c0_i32, %c0_i32_0 : i32, i32
  }
}

</mosaic_0001>

<bundles_post_ra>
// kernel: tpu_custom_call.1
= control target key start
LH: loop header
LB: loop body
LE: loop exit
PB: predicated region body
PF: predicated region fallthrough
CT: control target
= control target key end

     0   :  { %s5209_s0 = inlined_call_operand.vmem [shape: bf16[32,2,512], index: 0, kind: input, shape index: {}]   ;;  %s5210_s1 = inlined_call_operand.hbm [shape: bf16[32,32,512], index: 1, kind: input, shape index: {}]   ;;  %s5211_s2 = inlined_call_operand.vmem [shape: f32[32,32], index: 2, kind: input, shape index: {}]   ;;  %s5212_s3 = inlined_call_operand.hbm [shape: bf16[32,8,32], index: 3, kind: input, shape index: {}]   ;;  %s5213_s4 = inlined_call_operand.vmem [shape: f32[32,8], index: 4, kind: input, shape index: {}]   ;;  %s5214_s5 = inlined_call_operand.hbm [shape: bf16[256,512], index: 5, kind: input, shape index: {}]   ;;  %s5215_s6 = inlined_call_operand.vmem [shape: f32[1,512], index: 6, kind: input, shape index: {}]   ;;  %s5216_s7 = inlined_call_operand.hbm [shape: bf16[512,256], index: 7, kind: input, shape index: {}]   ;;  %s5217_s8 = inlined_call_operand.vmem [shape: f32[1,256], index: 8, kind: input, shape index: {}]   ;;  %s5218_s9 = inlined_call_operand.vmem [shape: bf16[256,6], index: 9, kind: input, shape index: {}]   ;;  %s5219_s10 = inlined_call_operand.hbm [shape: f32[2,6], index: 10, kind: output, shape index: {}]  }
   0x1   :  { %5232 = sst [smem:[#allocation19_spill]] %s5212_s3 }
   0x2   :  { %5233 = sst [smem:[#allocation20_spill]] %s5215_s6 }
   0x3   :  { %5234 = sst [smem:[#allocation21_spill]] %s5217_s8 }
   0x4   :  { %5235 = sst [smem:[#allocation22_spill]] %s5218_s9 }
   0x5   :  { %5236 = sst [smem:[#allocation23_spill]] %s5219_s10 }
   0x6   :  { %15 = vsyncpa [#allocation4], 0 }
   0x7   :  { %17 = vsyncpa [#allocation4 + $0x1], 0 }
   0x8   :  { %18 = vsyncpa [#allocation7], 0 }
   0x9   :  { %20 = vsyncpa [#allocation7 + $0x1], 0 }
   0xa   :  { %21 = vsyncpa [#allocation10], 0 }
   0xb   :  { %22 = vsyncpa [#allocation5], 0  ;;  %s4651_s13 = smov 0   ;;  %s4653_s14 = smov 0  }
   0xc   :  { %s4655_s15 = smov 0   ;;  %s4657_s16 = smov 0  }
   0xd LB: > { %5237 = sst [smem:[#allocation16_spill]] %s4565_s15  ;;  %s4672_s17 = sadd.s32 1, %s4569_s16   ;;  %s4569_s16 = sphi %s4657_s16, %s5258_s16   ;;  %s4565_s15 = sphi %s4655_s15, %s5260_s15   ;;  %s4561_s14 = sphi %s4653_s14, %s5262_s14   ;;  %s4557_s13 = sphi %s4651_s13, %s5261_s13  }
   0xe   : > { %5238 = sst [smem:[#allocation17_spill]] %s4672_s17  ;;  %s61_s18 = sadd.s32 1, %s4565_s15 }
   0xf   : > { %s58_s19 = ssub.s32 %s4569_s16, %s4672_s17  ;;  %p68_p0 = scmp.ne.s32.totalorder %s4565_s15, %s4561_s14 }
  0x10   : > { %p59_p1 = scmp.eq.s32.totalorder %s58_s19, 0  ;;  %p69_p2 = scmp.eq.s32.totalorder %s4569_s16, 0 }
  0x11   : > { %p4088_p3 = scmp.lt.s32.totalorder %s4569_s16, 4  ;;  %s4685_s21 = sand.u32 1, %s4565_s15  }
  0x12   : > { %s4682_s20 = scalar_select %p59_p1, %s4565_s15, %s61_s18  }
  0x13   : > { %p70_p4 = por %p69_p2, %p68_p0  ;;  %s356_s22 = sand.u32 1, %s4569_s16  }
  0x14   : > { %5239 = sst [smem:[#allocation18_spill]] %s4682_s20  ;;  %s3725_s23 = sshll.u32 %s4685_s21, 5 }
  0x15   : > { %p4689_p5 = pnand %p4088_p3, %p70_p4  ;;  %s3926_s25 = sshll.u32 %s4569_s16, 9 }
  0x16   : > { %s5241_s3 = sld [smem:[#allocation19_spill]]  ;;  %s360_s29 = scalar_lea.vmem [#allocation6], %s3725_s23 }
  0x17   : > { %s5240_s24 = scalar_select %p4689_p5, 1, 0 }
  0x18   : > { %s367_s30 = sshll.u32 %s360_s29, 4  ;;  %s4701_s11 = scalar_lea.sflag [#allocation7], %s356_s22  ;;  %s4699_s30 = int_to_ptr.vmem [resolvable:$true] %s367_s30 }
  0x19   : > { %p4707_p7 = pneg %p4689_p5 }
  0x1b   : > { %s5242_s18 = scalar_select %p4707_p7, 1, 0 }
  0x1c   : > { %s4697_s28 = scalar_lea.hbm %s5241_s3, %s3926_s25  ;;  %s4384_s23 = scalar_lea.hbm %s5241_s3, 2048 }
  0x1d   : > { %s4379_s12 = scalar_lea.hbm %s4697_s28, 512  ;;  %p4385_p10 = scmp.lt.u32.totalorder %s4697_s28, %s5241_s3 }
  0x1e   : > { %p4380_p6 = scmp.ne.s32.totalorder %s4697_s28, %s4379_s12  ;;  %p4386_p11 = scmp.lt.u32.totalorder %s4384_s23, %s4379_s12 }
  0x1f   : > { %p4388_p13 = scmp.lt.u32.totalorder %s4379_s12, %s4697_s28 }
  0x20   : > { %p4382_p8 = pnand %p4707_p7, %p4380_p6  ;;  %p4387_p12 = por %p4386_p11, %p4385_p10 }
  0x22   : > { %p4383_p9 = pneg %p4382_p8  ;;  %p4389_p0 = por %p4388_p13, %p4387_p12 }
  0x24   : > { %p4390_p1 = pnand %p4389_p0, %p4383_p9 }
  0x26   : > { %4393 = shalt.err (!%p4390_p1)
}
  0x27   : > { %s4394_s22 = scalar_lea.vmem %s4699_s30, 512  ;;  %s4571_s29 = smov [#allocation6]  }
  0x28   : > { %p4395_p2 = scmp.ne.s32.totalorder %s4699_s30, %s4394_s22  ;;  %s4399_s19 = sshll.u32 %s4571_s29, 4  ;;  %s4400_s19 = int_to_ptr.vmem [resolvable:$false] %s4399_s19 }
  0x29   : > { %s4401_s25 = scalar_lea.vmem %s4400_s19, 1024  ;;  %p4402_p6 = scmp.lt.s32.totalorder %s4699_s30, %s4400_s19 }
  0x2a   : > { %p4397_p3 = pnand %p4395_p2, %p4707_p7  ;;  %p4403_p8 = scmp.lt.s32.totalorder %s4401_s25, %s4394_s22 }
  0x2c   : > { %p4398_p4 = pneg %p4397_p3  ;;  %p4404_p10 = por %p4403_p8, %p4402_p6 }
  0x2e   : > { %p4405_p11 = pnand %p4404_p10, %p4398_p4 }
  0x30   : > { %4408 = shalt.err (!%p4405_p11)
}
  0x31   : > { %s4572_s12 = smov 64   ;;  %s4573_s23 = smov 4  }
  0x32   : > { %4083 = dma.hbm_to_vmem [thread:$0]  (!%p4689_p5), %s4697_s28, 512, %s4699_s30, %s4701_s11, %s4572_s12, %s4572_s12, %s4573_s23  }
  0x33   : > { %s4732_s26 = sadd.s32 4294967295, %s4569_s16   ;;  %p74_p12 = scmp.ne.s32.totalorder %s4561_s14, %s4557_s13 }
  0x34   : > { %p5225_p9 = scmp.eq.s32.totalorder %s4732_s26, 0  ;;  %p3718_p13 = scmp.ge.s32.totalorder %s4569_s16, 1 }
  0x35   : > { %p284_p0 = scmp.lt.s32.totalorder %s4569_s16, 5  ;;  %s4574_s28 = smov [#allocation9]  }
  0x36   : > { %p4742_p2 = por %p5225_p9, %p74_p12  ;;  %s305_s30 = sshll.u32 %s4574_s28, 4  ;;  %s4750_s30 = int_to_ptr.vmem [resolvable:$true] %s305_s30 }
  0x37   : > { %p4746_p3 = pnand %p3718_p13, %p284_p0  ;;  %s3721_s13 = sshll.u32 %s4685_s21, 9 }
  0x38   : > { %s5243_s27 = scalar_select %p4742_p2, 1, 0 }
  0x39   : > { %s5244_s22 = scalar_select %p4746_p3, 1, 0 }
  0x3a   : > { %p4073_p4 = pneg %p4746_p3  ;;  %s3925_s19 = sshll.u32 %s4569_s16, 13 }
  0x3b   : > { %s338_s25 = scalar_lea.vmem [#allocation3], %s3721_s13  ;;  %s4765_s20 = scalar_lea.hbm %s5210_s1, %s3925_s19 }
  0x3c   : > { %p4757_p6 = pnand %p4073_p4, %p5225_p9  ;;  %s346_s12 = sshll.u32 %s338_s25, 4  ;;  %s4788_s12 = int_to_ptr.vmem [resolvable:$true] %s346_s12 }
  0x3d   : > { %s4409_s17 = scalar_lea.hbm %s5216_s7, 8192 }
  0x3e   : > { %p4410_p8 = scmp.ne.s32.totalorder %s5216_s7, %s4409_s17  ;;  %p4411_p10 = pneg %p4757_p6 }
  0x3f   : > { %p4416_p13 = scmp.lt.u32.totalorder %s4409_s17, %s5216_s7 }
  0x40   : > { %p4412_p11 = pnand %p4411_p10, %p4410_p8 }
  0x42   : > { %p4413_p12 = pneg %p4412_p11 }
  0x44   : > { %p4418_p0 = pnand %p4416_p13, %p4413_p12 }
  0x46   : > { %4421 = shalt.err (!%p4418_p0)
}
  0x47   : > { %s4422_s3 = scalar_lea.vmem %s4750_s30, 8192  ;;  %p4430_p2 = scmp.lt.s32.totalorder %s4750_s30, %s4750_s30 }
  0x48   : > { %p4423_p4 = scmp.ne.s32.totalorder %s4750_s30, %s4422_s3  ;;  %p4431_p3 = scmp.lt.s32.totalorder %s4422_s3, %s4422_s3 }
  0x4a   : > { %p4425_p1 = pnand %p4423_p4, %p4411_p10  ;;  %p4432_p5 = por %p4431_p3, %p4430_p2 }
  0x4c   : > { %p4426_p9 = pneg %p4425_p1 }
  0x4e   : > { %p4433_p7 = pnand %p4432_p5, %p4426_p9 }
  0x50   : > { %4436 = shalt.err (!%p4433_p7)
}
  0x51   : > { %s4575_s8 = smov 128   ;;  %s4576_s9 = smov 8  }
  0x52   : > { %4076 = dma.hbm_to_vmem [thread:$0]  (!%p4757_p6), %s5216_s7, 8192, %s4750_s30, [#allocation10], %s4575_s8, %s4575_s8, %s4576_s9  }
  0x53   : > { %s3728_s17 = sshll.u32 %s4685_s21, 7  ;;  %s335_s19 = scalar_lea.sflag [#allocation4], %s4685_s21 }
  0x54   : > { %s4437_s25 = scalar_lea.hbm %s4765_s20, 8192  ;;  %p5246_p7 = scmp.ne.s32.totalorder %s5242_s18, 0 }
  0x55   : > { %p4438_p5 = scmp.ne.s32.totalorder %s4765_s20, %s4437_s25  ;;  %s4442_s13 = scalar_lea.hbm %s5210_s1, 32768 }
  0x56   : > { %p4443_p2 = scmp.lt.u32.totalorder %s4765_s20, %s5210_s1  ;;  %p4444_p3 = scmp.lt.u32.totalorder %s4442_s13, %s4437_s25 }
  0x57   : > { %p4440_p9 = pnand %p4438_p5, %p5246_p7  ;;  %p4446_p6 = scmp.lt.u32.totalorder %s4437_s25, %s4765_s20 }
  0x58   : > { %p4445_p8 = por %p4444_p3, %p4443_p2 }
  0x59   : > { %p4441_p1 = pneg %p4440_p9 }
  0x5a   : > { %p4447_p10 = por %p4446_p6, %p4445_p8 }
  0x5c   : > { %p4448_p11 = pnand %p4447_p10, %p4441_p1 }
  0x5e   : > { %4451 = shalt.err (!%p4448_p11)
}
  0x5f   : > { %s4452_s30 = scalar_lea.vmem %s4788_s12, 8192  ;;  %s4577_s29 = smov [#allocation3]  }
  0x60   : > { %p4453_p12 = scmp.ne.s32.totalorder %s4788_s12, %s4452_s30  ;;  %s4457_s8 = sshll.u32 %s4577_s29, 4  ;;  %s4458_s8 = int_to_ptr.vmem [resolvable:$false] %s4457_s8 }
  0x61   : > { %s4459_s6 = scalar_lea.vmem %s4458_s8, 16384  ;;  %p4460_p4 = scmp.lt.s32.totalorder %s4788_s12, %s4458_s8 }
  0x62   : > { %p4455_p13 = pnand %p4453_p12, %p5246_p7  ;;  %p4461_p5 = scmp.lt.s32.totalorder %s4459_s6, %s4452_s30 }
  0x64   : > { %p4456_p0 = pneg %p4455_p13  ;;  %p4462_p9 = por %p4461_p5, %p4460_p4 }
  0x66   : > { %p4463_p2 = pnand %p4462_p9, %p4456_p0 }
  0x68   : > { %4466 = shalt.err (!%p4463_p2)
}
  0x69   : > { %s4578_s9 = smov 256   ;;  %s4579_s10 = smov 16  }
  0x6a   : > { %p5247_p1 = scmp.ne.s32.totalorder %s5240_s24, 0  ;;  %s3928_s15 = sshll.u32 %s4569_s16, 11 }
  0x6b   : > { %s4822_s28 = scalar_lea.hbm %s5214_s5, %s3928_s15  ;;  %s381_s13 = scalar_lea.vmem [#allocation8], %s3728_s17 }
  0x6c   : > { %4080 = dma.hbm_to_vmem [thread:$0]  (!%p5247_p1), %s4765_s20, 8192, %s4788_s12, %s335_s19, %s4578_s9, %s4578_s9, %s4579_s10  }
  0x6d   : > { %s389_s3 = sshll.u32 %s381_s13, 4  ;;  %s4467_s30 = scalar_lea.hbm %s4822_s28, 2048  ;;  %s4826_s3 = int_to_ptr.vmem [resolvable:$true] %s389_s3 }
  0x6e   : > { %p4468_p3 = scmp.ne.s32.totalorder %s4822_s28, %s4467_s30  ;;  %s4472_s12 = scalar_lea.hbm %s5214_s5, 8192 }
  0x6f   : > { %p4473_p10 = scmp.lt.u32.totalorder %s4822_s28, %s5214_s5  ;;  %p4474_p11 = scmp.lt.u32.totalorder %s4472_s12, %s4467_s30 }
  0x70   : > { %p4470_p8 = pnand %p4468_p3, %p5246_p7  ;;  %p4476_p13 = scmp.lt.u32.totalorder %s4467_s30, %s4822_s28 }
  0x71   : > { %p4475_p12 = por %p4474_p11, %p4473_p10 }
  0x72   : > { %p4471_p6 = pneg %p4470_p8 }
  0x73   : > { %p4477_p0 = por %p4476_p13, %p4475_p12 }
  0x75   : > { %p4478_p4 = pnand %p4477_p0, %p4471_p6 }
  0x77   : > { %4481 = shalt.err (!%p4478_p4)
}
  0x78   : > { %s4482_s21 = scalar_lea.vmem %s4826_s3, 2048  ;;  %s4580_s17 = smov [#allocation8]  }
  0x79   : > { %p4483_p5 = scmp.ne.s32.totalorder %s4826_s3, %s4482_s21  ;;  %s4487_s8 = sshll.u32 %s4580_s17, 4  ;;  %s4488_s8 = int_to_ptr.vmem [resolvable:$false] %s4487_s8 }
  0x7a   : > { %s4489_s6 = scalar_lea.vmem %s4488_s8, 4096  ;;  %p4490_p3 = scmp.lt.s32.totalorder %s4826_s3, %s4488_s8 }
  0x7b   : > { %p4485_p9 = pnand %p4483_p5, %p5246_p7  ;;  %p4491_p8 = scmp.lt.s32.totalorder %s4489_s6, %s4482_s21 }
  0x7d   : > { %p4486_p2 = pneg %p4485_p9  ;;  %p4492_p10 = por %p4491_p8, %p4490_p3 }
  0x7f   : > { %p4493_p11 = pnand %p4492_p10, %p4486_p2 }
  0x81   : > { %4496 = shalt.err (!%p4493_p11)
}
  0x82   : > { %4086 = dma.hbm_to_vmem [thread:$0]  (!%p5247_p1), %s4822_s28, 2048, %s4826_s3, %s4701_s11, %s4578_s9, %s4578_s9, %s4579_s10  }
  0x83   : > { %p5248_p7 = scmp.ne.s32.totalorder %s5244_s22, 0 }
  0x84   : > { %s403_s18 = sand.u32 (!%p5248_p7), 1, %s4561_s14   ;;  %p5249_p6 = scmp.ne.s32.totalorder (!%p5248_p7), %s5243_s27, 0 }
  0x85   : > { %401 = sbr.rel (%p5248_p7) target bundleno = 1722 (0x6ba), region = 60  ;;  %s3733_s15 = sshll.u32 (!%p5248_p7), %s403_s18, 9 }
  0x86   : > { %s404_s25 = scalar_lea.sflag (!%p5248_p7), [#allocation4], %s403_s18  ;;  %s4856_s23 = scalar_lea.vmem (!%p5248_p7), [#allocation3], %s3733_s15 }
  0x8c   : > { %4540 = dma.done.wait (%p5249_p6), %s404_s25, 8192  }
  0x8d   : > { %4542 = vsyncadd (%p5249_p6), %s404_s25, 4294959104  ;;  %s412_s24 = sand.u32 1, %s4732_s26   ;;  %s3734_s13 = sshll.u32 %s403_s18, 5 }
  0x8e   : > { %s413_s11 = scalar_lea.sflag [#allocation7], %s412_s24  ;;  %s4863_s9 = scalar_lea.vmem [#allocation6], %s3734_s13 }
  0x8f   : > { %4544 = dma.done.wait (%p5249_p6), %s413_s11, 2560  }
  0x90   : > { %4546 = vsyncadd (%p5249_p6), %s413_s11, 4294964736  ;;  %s3735_s22 = sshll.u32 %s403_s18, 7  ;;  %p5250_p1 = scmp.eq.s32.totalorder %s4732_s26, 0 }
  0x91   : > { %s4869_s10 = scalar_lea.vmem [#allocation8], %s3735_s22 }
  0x92   : > { %4548 = dma.done.wait (%p5250_p1), [#allocation10], 8192   ;;  %p5251_p12 = pmov %p5250_p1 }
  0x93   : > { %s4876_s28 = sshll.u32 %s4732_s26, 3  ;;  %p5252_p0 = scmp.ne.s32.totalorder %s4732_s26, 0 }
  0x94   : > { %4550 = vsyncadd (%p5251_p12), [#allocation10], 4294959104  ;;  %p477_p13 = scmp.lt.s32.totalorder %s4876_s28, 31  ;;  %v4581_v0 = vmov (!%p5252_p0), 0.0  }
  0x95   : > { %489 = sbr.rel (%p5252_p0) target bundleno = 156 (0x9c), region = 80  ;;  %490 = vst [vmem:[#allocation2] sm:$0xff] (!%p5252_p0), %v4581_v0 }
  0x96   : > { %s478_s3 = scalar_select %p477_p13, %s4876_s28, 31 }
  0x98   : > { %s3738_s30 = sshll.u32 %s478_s3, 2 }
  0x99   : > { %s4883_s20 = scalar_lea.vmem %s5209_s0, %s3738_s30 }
  0x9c PF: > { %v4146_v1 = vld [vmem:[%s4856_s23 + $0x4] ss:$16 sps:$4 sm:$0xff]   ;;  %v571_v2 = vlaneseq  ;;  %v4582_v4 = vmov 1966171168   ;;  %v4150_v6 = vld [vmem:[%s4856_s23] ss:$16 sps:$4 sm:$0xff]   ;;  %s564_s29 = scalar_lea.vmem %s5211_s2, %s4876_s28  ;;  %s2547_s8 = scalar_lea.vmem %s5213_s4, %s4876_s28 }
  0x9d   : > { %v4148_v3 = vld [vmem:[%s4856_s23 + $0x44] ss:$16 sps:$4 sm:$0xff]   ;;  %v569_v5 = vunpack.c.l.s4 %v4582_v4  ;;  %725 = vmatprep.subr.bf16.mxu0 %v4146_v1  ;;  %v4151_v7 = vld [vmem:[%s4856_s23 + $0x40] ss:$16 sps:$4 sm:$0xff]   ;;  %v4160_v20 = vld [vmem:[%s4856_s23 + $0xc] ss:$16 sps:$4 sm:$0xff]  }
  0x9e   : > { %v4891_v8 = vshrl.u32 %v571_v2, 7  ;;  %874 = vmatprep.subr.bf16.mxu1 %v4148_v3  ;;  %v4152_v9 = vld [vmem:[%s4856_s23 + $0x24] ss:$16 sps:$4 sm:$0xff]   ;;  %726 = vmatpush1.bf16.xpose.msra.mxu0 %v4150_v6  ;;  %v4156_v15 = vld [vmem:[%s4856_s23 + $0x20] ss:$16 sps:$4 sm:$0xff]   ;;  %vm4584_vm0 = vmmov 0  }
  0x9f   : > { %v570_v10 = vunpack.c.0.s8 %v569_v5  ;;  %875 = vmatpush1.bf16.xpose.msra.mxu1 %v4151_v7  ;;  %v4154_v11 = vld [vmem:[%s4856_s23 + $0x64] ss:$16 sps:$4 sm:$0xff]   ;;  %727 = vmatprep.subr.bf16.mxu0 %v4152_v9  ;;  %v3741_v12 = vld.sshfl [vmem:[%s4883_s20] sm:$0x33 pattern:$0x75316420] }
  0xa0   : > { %876 = vmatprep.subr.bf16.mxu1 %v4154_v11  ;;  %v664_v14 = vcombine.high %v3741_v12, %v3741_v12  ;;  %v3750_v16 = vld.sshfl [vmem:[%s4883_s20 + $0x4] sm:$0x33 pattern:$0x75316420]  ;;  %v4157_v17 = vld [vmem:[%s4856_s23 + $0x60] ss:$16 sps:$4 sm:$0xff]  }
  0xa1   : > { %v4897_v13 = vsub.s32 %v570_v10, %v4891_v8  ;;  %v813_v19 = vcombine.high %v3750_v16, %v3750_v16  ;;  %v4163_v22 = vld [vmem:[%s4856_s23 + $0x4c] ss:$16 sps:$4 sm:$0xff]   ;;  %v4158_v23 = vld [vmem:[%s4856_s23 + $0x8] ss:$16 sps:$4 sm:$0xff]   ;;  %v4172_v33 = vld [vmem:[%s4856_s23 + $0x84] ss:$16 sps:$4 sm:$0xff]  }
  0xa2   : > { %v4161_v26 = vld [vmem:[%s4856_s23 + $0x48] ss:$16 sps:$4 sm:$0xff]   ;;  %v4166_v27 = vld [vmem:[%s4856_s23 + $0x2c] ss:$16 sps:$4 sm:$0xff]   ;;  %v4175_v34 = vld [vmem:[%s4856_s23 + $0xc4] ss:$16 sps:$4 sm:$0xff]  }
  0xa3   : > { %v678_v18 = vrot.slane %v664_v14, %v4897_v13  ;;  %v827_v21 = vrot.slane %v813_v19, %v4897_v13  ;;  %v671_v24 = vrot.slane %v3741_v12, %v4897_v13  ;;  %v820_v25 = vrot.slane %v3750_v16, %v4897_v13  ;;  %v4169_v28 = vld [vmem:[%s4856_s23 + $0x6c] ss:$16 sps:$4 sm:$0xff]   ;;  %v4164_v31 = vld [vmem:[%s4856_s23 + $0x28] ss:$16 sps:$4 sm:$0xff]   ;;  %v4170_v41 = vld [vmem:[%s4856_s23 + $0x80] ss:$16 sps:$4 sm:$0xff]  }
  0xa4   : > { %v4167_v32 = vld [vmem:[%s4856_s23 + $0x68] ss:$16 sps:$4 sm:$0xff]   ;;  %v3759_v35 = vld.sshfl [vmem:[%s4883_s20 + $0x8] sm:$0x33 pattern:$0x75316420] }
  0xa5   : > { %757 = vmatprep.mubr.bf16.mxu0 %v678_v18  ;;  %906 = vmatprep.mubr.bf16.mxu1 %v827_v21  ;;  %v680_v29 = vcombine.high %v678_v18, %v678_v18  ;;  %v829_v30 = vcombine.high %v827_v21, %v827_v21  ;;  %v3768_v36 = vld.sshfl [vmem:[%s4883_s20 + $0xc] sm:$0x33 pattern:$0x75316420]  ;;  %v962_v37 = vcombine.high %v3759_v35, %v3759_v35  ;;  %v4173_v42 = vld [vmem:[%s4856_s23 + $0xc0] ss:$16 sps:$4 sm:$0xff]  }
  0xa6   : > { %728 = vmatpush1.bf16.xpose.msra.mxu0 %v4156_v15  ;;  %v1111_v38 = vcombine.high %v3768_v36, %v3768_v36  ;;  %v679_v39 = vcombine.high %v671_v24, %v671_v24  ;;  %v828_v40 = vcombine.high %v820_v25, %v820_v25  ;;  %v4178_v43 = vld [vmem:[%s4856_s23 + $0xa4] ss:$16 sps:$4 sm:$0xff]   ;;  %v4176_v47 = vld [vmem:[%s4856_s23 + $0xa0] ss:$16 sps:$4 sm:$0xff]   ;;  %v4184_v49 = vld [vmem:[%s4856_s23 + $0x8c] ss:$16 sps:$4 sm:$0xff]   ;;  %v969_v53 = vrot.slane %v3759_v35, %v4897_v13 }
  0xa7   : > { %877 = vmatpush1.bf16.xpose.msra.mxu1 %v4157_v17  ;;  %765 = vmatprep.subr.bf16.mxu0 %v4160_v20  ;;  %v4181_v44 = vld [vmem:[%s4856_s23 + $0xe4] ss:$16 sps:$4 sm:$0xff]   ;;  %v976_v45 = vrot.slane %v962_v37, %v4897_v13  ;;  %v4179_v48 = vld [vmem:[%s4856_s23 + $0xe0] ss:$16 sps:$4 sm:$0xff]   ;;  %v4187_v50 = vld [vmem:[%s4856_s23 + $0xcc] ss:$16 sps:$4 sm:$0xff]   ;;  %v1118_v54 = vrot.slane %v3768_v36, %v4897_v13 }
  0xa8   : > { %914 = vmatprep.subr.bf16.mxu1 %v4163_v22  ;;  %v1125_v46 = vrot.slane %v1111_v38, %v4897_v13  ;;  %v4182_v51 = vld [vmem:[%s4856_s23 + $0x88] ss:$16 sps:$4 sm:$0xff]   ;;  %v4190_v55 = vld [vmem:[%s4856_s23 + $0xac] ss:$16 sps:$4 sm:$0xff]   ;;  %v4196_v61 = vld [vmem:[%s4856_s23 + $0x104] ss:$16 sps:$4 sm:$0xff]   ;;  %v977_v3 = vcombine.high %v969_v53, %v969_v53 }
  0xa9   : > { %v4185_v52 = vld [vmem:[%s4856_s23 + $0xc8] ss:$16 sps:$4 sm:$0xff]   ;;  %v4193_v56 = vld [vmem:[%s4856_s23 + $0xec] ss:$16 sps:$4 sm:$0xff]   ;;  %v978_v57 = vcombine.high %v976_v45, %v976_v45  ;;  %v4199_v62 = vld [vmem:[%s4856_s23 + $0x144] ss:$16 sps:$4 sm:$0xff]   ;;  %v1126_v4 = vcombine.high %v1118_v54, %v1118_v54 }
  0xaa   : > { %v1127_v58 = vcombine.high %v1125_v46, %v1125_v46  ;;  %v4188_v59 = vld [vmem:[%s4856_s23 + $0xa8] ss:$16 sps:$4 sm:$0xff]   ;;  %v3786_v0 = vld.sshfl [vmem:[%s4883_s20 + $0x14] sm:$0x33 pattern:$0x75316420] }
  0xab   : > { %v4191_v60 = vld [vmem:[%s4856_s23 + $0xe8] ss:$16 sps:$4 sm:$0xff]   ;;  %v1409_v2 = vcombine.high %v3786_v0, %v3786_v0  ;;  %v4194_v5 = vld [vmem:[%s4856_s23 + $0x100] ss:$16 sps:$4 sm:$0xff]   ;;  %v4202_v7 = vld [vmem:[%s4856_s23 + $0x124] ss:$16 sps:$4 sm:$0xff]   ;;  %v1416_v18 = vrot.slane %v3786_v0, %v4897_v13 }
  0xac   : > { %v3777_v63 = vld.sshfl [vmem:[%s4883_s20 + $0x10] sm:$0x33 pattern:$0x75316420]  ;;  %v4197_v6 = vld [vmem:[%s4856_s23 + $0x140] ss:$16 sps:$4 sm:$0xff]  }
  0xad   : > { %758 = vmatmul.mubr.bf16.vlgmr.msra.gmra.mrb[0].mxu0 %v671_v24  ;;  %v1260_v1 = vcombine.high %v3777_v63, %v3777_v63  ;;  %v4205_v9 = vld [vmem:[%s4856_s23 + $0x164] ss:$16 sps:$4 sm:$0xff]   ;;  %v1423_v11 = vrot.slane %v1409_v2, %v4897_v13  ;;  %v4200_v12 = vld [vmem:[%s4856_s23 + $0x120] ss:$16 sps:$4 sm:$0xff]   ;;  %v4208_v15 = vld [vmem:[%s4856_s23 + $0x10c] ss:$16 sps:$4 sm:$0xff]   ;;  %v1267_v17 = vrot.slane %v3777_v63, %v4897_v13 }
  0xae   : > { %907 = vmatmul.mubr.bf16.vlgmr.msra.gmra.mrb[0].mxu1 %v820_v25  ;;  %766 = vmatpush1.bf16.xpose.msra.mxu0 %v4158_v23  ;;  %v4203_v14 = vld [vmem:[%s4856_s23 + $0x160] ss:$16 sps:$4 sm:$0xff]   ;;  %v4211_v16 = vld [vmem:[%s4856_s23 + $0x14c] ss:$16 sps:$4 sm:$0xff]   ;;  %v4206_v19 = vld [vmem:[%s4856_s23 + $0x108] ss:$16 sps:$4 sm:$0xff]  }
  0xaf   : > { %915 = vmatpush1.bf16.xpose.msra.mxu1 %v4161_v26  ;;  %767 = vmatprep.subr.bf16.mxu0 %v4166_v27  ;;  %v1274_v10 = vrot.slane %v1260_v1, %v4897_v13  ;;  %v4209_v20 = vld [vmem:[%s4856_s23 + $0x148] ss:$16 sps:$4 sm:$0xff]   ;;  %v4214_v21 = vld [vmem:[%s4856_s23 + $0x12c] ss:$16 sps:$4 sm:$0xff]   ;;  %v1425_v24 = vcombine.high %v1423_v11, %v1423_v11  ;;  %v4220_v27 = vld [vmem:[%s4856_s23 + $0x184] ss:$16 sps:$4 sm:$0xff]  }
  0xb0   : > { %916 = vmatprep.subr.bf16.mxu1 %v4169_v28  ;;  %797 = vmatprep.mubr.bf16.mxu0 %v680_v29  ;;  %v4217_v22 = vld [vmem:[%s4856_s23 + $0x16c] ss:$16 sps:$4 sm:$0xff]   ;;  %v4212_v25 = vld [vmem:[%s4856_s23 + $0x128] ss:$16 sps:$4 sm:$0xff]   ;;  %v4223_v28 = vld [vmem:[%s4856_s23 + $0x1c4] ss:$16 sps:$4 sm:$0xff]  }
  0xb1   : > { %946 = vmatprep.mubr.bf16.mxu1 %v829_v30  ;;  %v1276_v23 = vcombine.high %v1274_v10, %v1274_v10  ;;  %v4215_v26 = vld [vmem:[%s4856_s23 + $0x168] ss:$16 sps:$4 sm:$0xff]   ;;  %v3795_v29 = vld.sshfl [vmem:[%s4883_s20 + $0x18] sm:$0x33 pattern:$0x75316420] }
  0xb2   : > { %v3804_v30 = vld.sshfl [vmem:[%s4883_s20 + $0x1c] sm:$0x33 pattern:$0x75316420]  ;;  %v4218_v35 = vld [vmem:[%s4856_s23 + $0x180] ss:$16 sps:$4 sm:$0xff]  }
  0xb3   : > { %v4221_v36 = vld [vmem:[%s4856_s23 + $0x1c0] ss:$16 sps:$4 sm:$0xff]   ;;  %v4226_v37 = vld [vmem:[%s4856_s23 + $0x1a4] ss:$16 sps:$4 sm:$0xff]   ;;  %vm1872_vm1 = vcmask 261120   ;;  %s4588_s6 = smov 8  }
  0xb4   : > { %v4229_v38 = vld [vmem:[%s4856_s23 + $0x1e4] ss:$16 sps:$4 sm:$0xff]   ;;  %s4589_s18 = smov 16   ;;  %s4590_s15 = smov 32   ;;  %vm2641_vm2 = vcmask 64512   ;;  %vm2645_vm3 = vcmask 130048  }
  0xb5   : > { %s4591_s25 = smov 48   ;;  %s4593_s24 = smov 40   ;;  %vm2648_vm4 = vcmask 195584   ;;  %vm2653_vm5 = vcmask 326656   ;;  %vm2656_vm6 = vcmask 392192   ;;  %vm2659_vm7 = vcmask 457728  }
  0xb6   : > { %768 = vmatpush1.bf16.xpose.msra.mxu0 %v4164_v31  ;;  %v1558_v31 = vcombine.high %v3795_v29, %v3795_v29  ;;  %s4594_s13 = smov 56   ;;  %vm2759_vm8 = vcmask 523264   ;;  %p3839_p4 = scmp.ne.s32.totalorder %s4732_s26, 3 }
  0xb7   : > { %917 = vmatpush1.bf16.xpose.msra.mxu1 %v4167_v32  ;;  %1023 = vmatprep.subr.bf16.mxu0 %v4172_v33  ;;  %v1707_v32 = vcombine.high %v3804_v30, %v3804_v30  ;;  %v1275_v33 = vcombine.high %v1267_v17, %v1267_v17  ;;  %s5253_s22 = sld [smem:[#allocation20_spill]] (!%p3839_p4)  ;;  %s5254_s3 = sld [smem:[#allocation22_spill]] (!%p3839_p4)  ;;  %vm3589_vm9 = vcmask (!%p3839_p4), 41984  }
  0xb8   : > { %1172 = vmatprep.subr.bf16.mxu1 %v4175_v34  ;;  %v1424_v34 = vcombine.high %v1416_v18, %v1416_v18 }
  0xbd   : > { %798 = vmatmul.mubr.bf16.vlgmr.msra.gmra.mrb[0].mxu0 %v679_v39  ;;  %v1572_v39 = vrot.slane %v1558_v31, %v4897_v13 }
  0xbe   : > { %947 = vmatmul.mubr.bf16.vlgmr.msra.gmra.mrb[0].mxu1 %v828_v40  ;;  %1024 = vmatpush1.bf16.xpose.msra.mxu0 %v4170_v41  ;;  %v1721_v40 = vrot.slane %v1707_v32, %v4897_v13  ;;  %v4224_v41 = vld [vmem:[%s4856_s23 + $0x1a0] ss:$16 sps:$4 sm:$0xff]  }
  0xbf   : > { %1173 = vmatpush1.bf16.xpose.msra.mxu1 %v4173_v42  ;;  %1025 = vmatprep.subr.bf16.mxu0 %v4178_v43  ;;  %v4227_v42 = vld [vmem:[%s4856_s23 + $0x1e0] ss:$16 sps:$4 sm:$0xff]   ;;  %v4232_v43 = vld [vmem:[%s4856_s23 + $0x18c] ss:$16 sps:$4 sm:$0xff]  }
  0xc0   : > { %1174 = vmatprep.subr.bf16.mxu1 %v4181_v44  ;;  %1055 = vmatprep.mubr.bf16.mxu0 %v976_v45  ;;  %v4235_v44 = vld [vmem:[%s4856_s23 + $0x1cc] ss:$16 sps:$4 sm:$0xff]   ;;  %v1565_v45 = vrot.slane %v3795_v29, %v4897_v13 }
  0xc1   : > { %1204 = vmatprep.mubr.bf16.mxu1 %v1125_v46  ;;  %v1714_v46 = vrot.slane %v3804_v30, %v4897_v13 }
  0xc6   : > { %1026 = vmatpush1.bf16.xpose.msra.mxu0 %v4176_v47  ;;  %v4230_v47 = vld [vmem:[%s4856_s23 + $0x188] ss:$16 sps:$4 sm:$0xff]  }
  0xc7   : > { %1175 = vmatpush1.bf16.xpose.msra.mxu1 %v4179_v48  ;;  %1063 = vmatprep.subr.bf16.mxu0 %v4184_v49  ;;  %v4233_v48 = vld [vmem:[%s4856_s23 + $0x1c8] ss:$16 sps:$4 sm:$0xff]   ;;  %v4238_v49 = vld [vmem:[%s4856_s23 + $0x1ac] ss:$16 sps:$4 sm:$0xff]  }
  0xc8   : > { %1212 = vmatprep.subr.bf16.mxu1 %v4187_v50  ;;  %v4241_v50 = vld [vmem:[%s4856_s23 + $0x1ec] ss:$16 sps:$4 sm:$0xff]  }
  0xcd   : > { %1056 = vmatmul.mubr.bf16.vlgmr.msra.gmra.mrb[4].mxu0 %v969_v53  ;;  %v4236_v53 = vld [vmem:[%s4856_s23 + $0x1a8] ss:$16 sps:$4 sm:$0xff]  }
  0xce   : > { %1205 = vmatmul.mubr.bf16.vlgmr.msra.gmra.mrb[4].mxu1 %v1118_v54  ;;  %1064 = vmatpush1.bf16.xpose.msra.mxu0 %v4182_v51  ;;  %v1574_v51 = vcombine.high %v1572_v39, %v1572_v39  ;;  %v4239_v54 = vld [vmem:[%s4856_s23 + $0x1e8] ss:$16 sps:$4 sm:$0xff]   ;;  %s4592_s23 = smov 24  }
  0xcf   : > { %1213 = vmatpush1.bf16.xpose.msra.mxu1 %v4185_v52  ;;  %1065 = vmatprep.subr.bf16.mxu0 %v4190_v55  ;;  %v1723_v52 = vcombine.high %v1721_v40, %v1721_v40  ;;  %v4583_v55 = vmov 0.0  }
  0xd0   : > { %1214 = vmatprep.subr.bf16.mxu1 %v4193_v56  ;;  %1095 = vmatprep.mubr.bf16.mxu0 %v978_v57  ;;  %v1573_v56 = vcombine.high %v1565_v45, %v1565_v45  ;;  %v1722_v57 = vcombine.high %v1714_v46, %v1714_v46 }
  0xd1   : > { %1244 = vmatprep.mubr.bf16.mxu1 %v1127_v58  ;;  %v4990_v58 = vld [vmem:[%s564_s29] sm:$0xff] }
  0xd6   : > { %1066 = vmatpush1.bf16.xpose.msra.mxu0 %v4188_v59  ;;  %v574_v59 = vrot.slane %v4990_v58, %v4897_v13 }
  0xd7   : > { %1215 = vmatpush1.bf16.xpose.msra.mxu1 %v4191_v60  ;;  %1321 = vmatprep.subr.bf16.mxu0 %v4196_v61 }
  0xd8   : > { %1470 = vmatprep.subr.bf16.mxu1 %v4199_v62  ;;  %v582_v60 = vcombine.high %v574_v59, %v574_v59  ;;  %v590_v61 = vrot.slane %v574_v59, %v4897_v13  ;;  %v4996_v62 = vsub.s32 0, %v4891_v8 }
  0xda   : > { %v604_v63 = vrot.slane %v582_v60, %v4897_v13  ;;  %v619_v0 = vrot.slane %v590_v61, %v4996_v62 }
  0xdc   : > { %v623_v1 = vrot.slane %v604_v63, %v4996_v62 }
  0xdd   : > { %1096 = vmatmul.mubr.bf16.vlgmr.msra.gmra.mrb[4].mxu0 %v977_v3 }
  0xde   : > { %1245 = vmatmul.mubr.bf16.vlgmr.msra.gmra.mrb[4].mxu1 %v1126_v4  ;;  %1322 = vmatpush1.bf16.xpose.msra.mxu0 %v4194_v5 }
  0xdf   : > { %1471 = vmatpush1.bf16.xpose.msra.mxu1 %v4197_v6  ;;  %1323 = vmatprep.subr.bf16.mxu0 %v4202_v7 }
  0xe0   : > { %1472 = vmatprep.subr.bf16.mxu1 %v4205_v9  ;;  %1353 = vmatprep.mubr.bf16.mxu0 %v1274_v10 }
  0xe1   : > { %1502 = vmatprep.mubr.bf16.mxu1 %v1423_v11 }
  0xe6   : > { %1324 = vmatpush1.bf16.xpose.msra.mxu0 %v4200_v12 }
  0xe7   : > { %1473 = vmatpush1.bf16.xpose.msra.mxu1 %v4203_v14  ;;  %1361 = vmatprep.subr.bf16.mxu0 %v4208_v15 }
  0xe8   : > { %1510 = vmatprep.subr.bf16.mxu1 %v4211_v16 }
  0xed   : > { %1354 = vmatmul.mubr.bf16.vlgmr.msra.gmra.mrb[8].mxu0 %v1267_v17 }
  0xee   : > { %1503 = vmatmul.mubr.bf16.vlgmr.msra.gmra.mrb[8].mxu1 %v1416_v18  ;;  %1362 = vmatpush1.bf16.xpose.msra.mxu0 %v4206_v19 }
  0xef   : > { %1511 = vmatpush1.bf16.xpose.msra.mxu1 %v4209_v20  ;;  %1363 = vmatprep.subr.bf16.mxu0 %v4214_v21  ;;  %v1864_v20 = vld [vmem:[%s4863_s9] sm:$0xf]  ;;  %v1865_v21 = vld [vmem:[%s4863_s9 + $0x4] sm:$0xf] }
  0xf0   : > { %1512 = vmatprep.subr.bf16.mxu1 %v4217_v22  ;;  %1393 = vmatprep.mubr.bf16.mxu0 %v1276_v23  ;;  %v612_v22 = vcombine.high %v590_v61, %v590_v61  ;;  %v614_v23 = vcombine.high %v604_v63, %v604_v63 }
  0xf1   : > { %1542 = vmatprep.mubr.bf16.mxu1 %v1425_v24 }
  0xf2   : > { %v627_v24 = vrot.slane %v612_v22, %v4996_v62 }
  0xf6   : > { %1364 = vmatpush1.bf16.xpose.msra.mxu0 %v4212_v25  ;;  %v631_v25 = vrot.slane %v614_v23, %v4996_v62 }
  0xf7   : > { %1513 = vmatpush1.bf16.xpose.msra.mxu1 %v4215_v26  ;;  %1619 = vmatprep.subr.bf16.mxu0 %v4220_v27 }
  0xf8   : > { %1768 = vmatprep.subr.bf16.mxu1 %v4223_v28 }
  0xfd   : > { %1394 = vmatmul.mubr.bf16.vlgmr.msra.gmra.mrb[8].mxu0 %v1275_v33 }
  0xfe   : > { %1543 = vmatmul.mubr.bf16.vlgmr.msra.gmra.mrb[8].mxu1 %v1424_v34  ;;  %1620 = vmatpush1.bf16.xpose.msra.mxu0 %v4218_v35 }
  0xff   : > { %1769 = vmatpush1.bf16.xpose.msra.mxu1 %v4221_v36  ;;  %1621 = vmatprep.subr.bf16.mxu0 %v4226_v37 }
 0x100   : > { %1770 = vmatprep.subr.bf16.mxu1 %v4229_v38  ;;  %1651 = vmatprep.mubr.bf16.mxu0 %v1572_v39 }
 0x101   : > { %1800 = vmatprep.mubr.bf16.mxu1 %v1721_v40 }
 0x106   : > { %1622 = vmatpush1.bf16.xpose.msra.mxu0 %v4224_v41 }
 0x107   : > { %1771 = vmatpush1.bf16.xpose.msra.mxu1 %v4227_v42  ;;  %1659 = vmatprep.subr.bf16.mxu0 %v4232_v43  ;;  %v1866_v42 = vld [vmem:[%s4863_s9 + $0x8] sm:$0xf]  ;;  %v1867_v43 = vld [vmem:[%s4863_s9 + $0xc] sm:$0xf] }
 0x108   : > { %1808 = vmatprep.subr.bf16.mxu1 %v4235_v44  ;;  %v567_v44 = vcombine.high %v4990_v58, %v4990_v58 }
 0x10d   : > { %1652 = vmatmul.mubr.bf16.vlgmr.msra.gmra.mrb[12].mxu0 %v1565_v45  ;;  %v581_v45 = vrot.slane %v567_v44, %v4897_v13 }
 0x10e   : > { %1801 = vmatmul.mubr.bf16.vlgmr.msra.gmra.mrb[12].mxu1 %v1714_v46  ;;  %1660 = vmatpush1.bf16.xpose.msra.mxu0 %v4230_v47 }
 0x10f   : > { %1809 = vmatpush1.bf16.xpose.msra.mxu1 %v4233_v48  ;;  %1661 = vmatprep.subr.bf16.mxu0 %v4238_v49  ;;  %v583_v46 = vcombine.high %v581_v45, %v581_v45  ;;  %v597_v47 = vrot.slane %v581_v45, %v4897_v13 }
 0x110   : > { %1810 = vmatprep.subr.bf16.mxu1 %v4241_v50  ;;  %1691 = vmatprep.mubr.bf16.mxu0 %v1574_v51 }
 0x111   : > { %1840 = vmatprep.mubr.bf16.mxu1 %v1723_v52  ;;  %v611_v48 = vrot.slane %v583_v46, %v4897_v13  ;;  %v635_v49 = vrot.slane %v597_v47, %v4996_v62 }
 0x113   : > { %v639_v50 = vrot.slane %v611_v48, %v4996_v62 }
 0x116   : > { %1662 = vmatpush1.bf16.xpose.msra.mxu0 %v4236_v53 }
 0x117   : > { %1811 = vmatpush1.bf16.xpose.msra.mxu1 %v4239_v54  ;;  %3967 = vmatprep.subr.bf16.mxu0 %v4583_v55 }
 0x118   : > { %3973 = vmatprep.subr.bf16.mxu1 %v4583_v55 }
 0x11d   : > { %1692 = vmatmul.mubr.bf16.vlgmr.msra.gmra.mrb[12].mxu0 %v1573_v56 }
 0x11e   : > { %1841 = vmatmul.mubr.bf16.vlgmr.msra.gmra.mrb[12].mxu1 %v1722_v57  ;;  %3969 = vmatprep.mubr.msk.bf16.mxu0 %vm4584_vm0, %v4583_v55 }
 0x11f   : > { %3975 = vmatprep.mubr.msk.bf16.mxu1 %vm4584_vm0, %v4583_v55 }
 0x190   : > { %v799_v2 = vpop.f32.mrb[0].mxu0 }
 0x191   : > { %v948_v3 = vpop.f32.mrb[0].mxu1  ;;  %v4015_v4 = vadd.f32 %v799_v2, %v619_v0  ;;  %v801_v6 = vpop.f32.mrb[1].mxu0 }
 0x192   : > { %v4016_v5 = vadd.f32 %v948_v3, %v623_v1  ;;  %v950_v7 = vpop.f32.mrb[1].mxu1  ;;  %v802_v9 = vpop.f32.mrb[2].mxu0  ;;  %v613_v6 = vcombine.high %v597_v47, %v597_v47 }
 0x193   : > { %v951_v10 = vpop.f32.mrb[2].mxu1  ;;  %v1848_v11 = vmax.f32 %v4015_v4, 0.0  ;;  %v803_v14 = vpop.f32.mrb[3].mxu0  ;;  %v1868_v4 = vld [vmem:[%s4863_s9 + $0x10] sm:$0xf]  ;;  %v615_v7 = vcombine.high %v611_v48, %v611_v48 }
 0x194   : > { %v1849_v12 = vmax.f32 %v4016_v5, 0.0  ;;  %v952_v15 = vpop.f32.mrb[3].mxu1  ;;  %v1869_v5 = vld [vmem:[%s4863_s9 + $0x14] sm:$0xf]  ;;  %v643_v9 = vrot.slane %v613_v6, %v4996_v62 }
 0x195   : > { %v1856_v16 = vpack.c.bf16 %v1848_v11, %v1848_v11  ;;  %v647_v10 = vrot.slane %v615_v7, %v4996_v62 }
 0x196   : > { %v1857_v17 = vpack.c.bf16 %v1849_v12, %v1849_v12 }
 0x197   : > { %v1877_v18 = vsel %vm1872_vm1, %v1856_v16, 0 }
 0x198   : > { %v1923_v19 = vsel %vm1872_vm1, %v1857_v17, 0  ;;  %3968 = vmatpush3.bf16.xpose.msra.mxu0 %v1877_v18 }
 0x199   : > { %3974 = vmatpush3.bf16.xpose.msra.mxu1 %v1923_v19  ;;  %3979 = vmatprep.subr.bf16.mxu0 %v4583_v55 }
 0x19a   : > { %3985 = vmatprep.subr.bf16.mxu1 %v4583_v55 }
 0x19f   : > { %3970 = vmatmul.mubr.msk.bf16.vlgmr.msra.gmra.mrb[16].mxu0 %vm1872_vm1, %v1864_v20 }
 0x1a0   : > { %3976 = vmatmul.mubr.msk.bf16.vlgmr.msra.gmra.mrb[16].mxu1 %vm1872_vm1, %v1865_v21  ;;  %3981 = vmatprep.mubr.msk.bf16.mxu0 %vm4584_vm0, %v4583_v55 }
 0x1a1   : > { %3987 = vmatprep.mubr.msk.bf16.mxu1 %vm4584_vm0, %v4583_v55 }
 0x1b0   : > { %v1097_v26 = vpop.f32.mrb[4].mxu0 }
 0x1b1   : > { %v1246_v27 = vpop.f32.mrb[4].mxu1  ;;  %v4017_v28 = vadd.f32 %v1097_v26, %v627_v24  ;;  %v1099_v30 = vpop.f32.mrb[5].mxu0 }
 0x1b2   : > { %v4018_v29 = vadd.f32 %v1246_v27, %v631_v25  ;;  %v1248_v31 = vpop.f32.mrb[5].mxu1  ;;  %v1100_v32 = vpop.f32.mrb[6].mxu0  ;;  %v1870_v27 = vld [vmem:[%s4863_s9 + $0x18] sm:$0xf] }
 0x1b3   : > { %v1249_v33 = vpop.f32.mrb[6].mxu1  ;;  %v1850_v34 = vmax.f32 %v4017_v28, 0.0  ;;  %v1101_v36 = vpop.f32.mrb[7].mxu0  ;;  %v1871_v28 = vld [vmem:[%s4863_s9 + $0x1c] sm:$0xf] }
 0x1b4   : > { %v1851_v35 = vmax.f32 %v4018_v29, 0.0  ;;  %v1250_v37 = vpop.f32.mrb[7].mxu1 }
 0x1b5   : > { %v1858_v38 = vpack.c.bf16 %v1850_v34, %v1850_v34 }
 0x1b6   : > { %v1859_v39 = vpack.c.bf16 %v1851_v35, %v1851_v35 }
 0x1b7   : > { %v1969_v40 = vsel %vm1872_vm1, %v1858_v38, 0 }
 0x1b8   : > { %v2015_v41 = vsel %vm1872_vm1, %v1859_v39, 0  ;;  %3980 = vmatpush3.bf16.xpose.msra.mxu0 %v1969_v40 }
 0x1b9   : > { %3986 = vmatpush3.bf16.xpose.msra.mxu1 %v2015_v41  ;;  %3991 = vmatprep.subr.bf16.mxu0 %v4583_v55 }
 0x1ba   : > { %3997 = vmatprep.subr.bf16.mxu1 %v4583_v55 }
 0x1bf   : > { %3982 = vmatmul.mubr.msk.bf16.vlgmr.msra.gmra.mrb[20].mxu0 %vm1872_vm1, %v1866_v42 }
 0x1c0   : > { %3988 = vmatmul.mubr.msk.bf16.vlgmr.msra.gmra.mrb[20].mxu1 %vm1872_vm1, %v1867_v43  ;;  %3993 = vmatprep.mubr.msk.bf16.mxu0 %vm4584_vm0, %v4583_v55 }
 0x1c1   : > { %3999 = vmatprep.mubr.msk.bf16.mxu1 %vm4584_vm0, %v4583_v55 }
 0x1d0   : > { %v1395_v51 = vpop.f32.mrb[8].mxu0 }
 0x1d1   : > { %v1544_v52 = vpop.f32.mrb[8].mxu1  ;;  %v4019_v53 = vadd.f32 %v1395_v51, %v635_v49  ;;  %v1397_v56 = vpop.f32.mrb[9].mxu0 }
 0x1d2   : > { %v4020_v54 = vadd.f32 %v1544_v52, %v639_v50  ;;  %v1546_v57 = vpop.f32.mrb[9].mxu1  ;;  %v1398_v58 = vpop.f32.mrb[10].mxu0 }
 0x1d3   : > { %v1547_v59 = vpop.f32.mrb[10].mxu1  ;;  %v1852_v60 = vmax.f32 %v4019_v53, 0.0  ;;  %v1399_v63 = vpop.f32.mrb[11].mxu0 }
 0x1d4   : > { %v1853_v61 = vmax.f32 %v4020_v54, 0.0  ;;  %v1548_v0 = vpop.f32.mrb[11].mxu1  ;;  %v4585_v63 = vmov 0  }
 0x1d5   : > { %v1860_v1 = vpack.c.bf16 %v1852_v60, %v1852_v60 }
 0x1d6   : > { %v1861_v13 = vpack.c.bf16 %v1853_v61, %v1853_v61 }
 0x1d7   : > { %v2061_v2 = vsel %vm1872_vm1, %v1860_v1, 0 }
 0x1d8   : > { %v2107_v3 = vsel %vm1872_vm1, %v1861_v13, 0  ;;  %3992 = vmatpush3.bf16.xpose.msra.mxu0 %v2061_v2  ;;  %v4586_v13 = vmov 1983009808  }
 0x1d9   : > { %3998 = vmatpush3.bf16.xpose.msra.mxu1 %v2107_v3  ;;  %4003 = vmatprep.subr.bf16.mxu0 %v4583_v55  ;;  %v2499_v2 = vunpack.c.l.s4 %v4586_v13 }
 0x1da   : > { %4009 = vmatprep.subr.bf16.mxu1 %v4583_v55 }
 0x1df   : > { %3994 = vmatmul.mubr.msk.bf16.vlgmr.msra.gmra.mrb[24].mxu0 %vm1872_vm1, %v1868_v4 }
 0x1e0   : > { %4000 = vmatmul.mubr.msk.bf16.vlgmr.msra.gmra.mrb[24].mxu1 %vm1872_vm1, %v1869_v5  ;;  %4005 = vmatprep.mubr.msk.bf16.mxu0 %vm4584_vm0, %v4583_v55  ;;  %v2500_v5 = vunpack.c.0.s8 %v2499_v2 }
 0x1e1   : > { %4011 = vmatprep.mubr.msk.bf16.mxu1 %vm4584_vm0, %v4583_v55 }
 0x1f0   : > { %v1693_v11 = vpop.f32.mrb[12].mxu0 }
 0x1f1   : > { %v1842_v12 = vpop.f32.mrb[12].mxu1  ;;  %v4021_v14 = vadd.f32 %v1693_v11, %v643_v9  ;;  %v1695_v16 = vpop.f32.mrb[13].mxu0  ;;  %v5057_v9 = vsub.s32 %v2500_v5, %v4891_v8  ;;  %v4587_v11 = vmov 1934713408   ;;  %v4263_v5 = vld [vmem:[%s4869_s10 + $0x64] ss:$16 sps:$4 sm:$0xff]  }
 0x1f2   : > { %v4022_v15 = vadd.f32 %v1842_v12, %v647_v10  ;;  %v1844_v17 = vpop.f32.mrb[13].mxu1  ;;  %v1696_v18 = vpop.f32.mrb[14].mxu0  ;;  %v2531_v12 = vunpack.c.l.s4 %v4587_v11 }
 0x1f3   : > { %v1845_v19 = vpop.f32.mrb[14].mxu1  ;;  %v1854_v20 = vmax.f32 %v4021_v14, 0.0  ;;  %v1697_v22 = vpop.f32.mrb[15].mxu0 }
 0x1f4   : > { %v1855_v21 = vmax.f32 %v4022_v15, 0.0  ;;  %v1846_v55 = vpop.f32.mrb[15].mxu1  ;;  %v2532_v16 = vunpack.c.0.s8 %v2531_v12 }
 0x1f5   : > { %v1862_v23 = vpack.c.bf16 %v1854_v20, %v1854_v20 }
 0x1f6   : > { %v1863_v24 = vpack.c.bf16 %v1855_v21, %v1855_v21  ;;  %v2535_v22 = vsub.s32 %v2532_v16, %v4891_v8 }
 0x1f7   : > { %v2153_v25 = vsel %vm1872_vm1, %v1862_v23, 0 }
 0x1f8   : > { %v2199_v26 = vsel %vm1872_vm1, %v1863_v24, 0  ;;  %4004 = vmatpush3.bf16.xpose.msra.mxu0 %v2153_v25 }
 0x1f9   : > { %4010 = vmatpush3.bf16.xpose.msra.mxu1 %v2199_v26 }
 0x1ff   : > { %4006 = vmatmul.mubr.msk.bf16.vlgmr.msra.gmra.mrb[28].mxu0 %vm1872_vm1, %v1870_v27 }
 0x200   : > { %4012 = vmatmul.mubr.msk.bf16.vlgmr.msra.gmra.mrb[28].mxu1 %vm1872_vm1, %v1871_v28  ;;  %2794 = vmatprep.mubr.bf16.mxu0 %v4585_v63  ;;  %v2548_v28 = vld [vmem:[%s2547_s8] sm:$0xff] }
 0x201   : > { %2835 = vmatprep.mubr.bf16.mxu1 %v4585_v63 }
 0x272   : > { %v1913_v29 = vpop.f32.mrb[16].mxu0 }
 0x273   : > { %v1959_v30 = vpop.f32.mrb[16].mxu1  ;;  %2241 = vxpose.xlu0.b32.start.end [1/1] (short) (narrow) %v1913_v29, 8  ;;  %v3971_v31 = vpop.f32.mrb[17].mxu0 }
 0x274   : > { %v3977_v32 = vpop.f32.mrb[17].mxu1  ;;  %v1916_v33 = vpop.f32.mrb[18].mxu0 }
 0x275   : > { %v1962_v34 = vpop.f32.mrb[18].mxu1  ;;  %v3972_v35 = vpop.f32.mrb[19].mxu0 }
 0x276   : > { %v3978_v36 = vpop.f32.mrb[19].mxu1  ;;  %v4243_v35 = vld [vmem:[%s4869_s10] ss:$16 sps:$4 sm:$0xff]  }
 0x277   : > { %2273 = vxpose.xlu0.b32.start.end [1/1] (short) (narrow) %v1959_v30, 8  ;;  %v4245_v36 = vld [vmem:[%s4869_s10 + $0x4] ss:$16 sps:$4 sm:$0xff]  }
 0x278   : > { %2762 = vmatprep.subr.bf16.mxu0 %v4245_v36 }
 0x279   : > { %2763 = vmatpush1.bf16.msra.mxu0 %v4243_v35 }
 0x292   : > { %v2005_v37 = vpop.f32.mrb[20].mxu0 }
 0x293   : > { %v2051_v38 = vpop.f32.mrb[20].mxu1  ;;  %2305 = vxpose.xlu1.b32.start.end [1/1] (short) (narrow) %v2005_v37, 8  ;;  %v3983_v39 = vpop.f32.mrb[21].mxu0  ;;  %v4246_v37 = vld [vmem:[%s4869_s10 + $0x8] ss:$16 sps:$4 sm:$0xff]  }
 0x294   : > { %v3989_v40 = vpop.f32.mrb[21].mxu1  ;;  %v2008_v41 = vpop.f32.mrb[22].mxu0 }
 0x295   : > { %v2054_v42 = vpop.f32.mrb[22].mxu1  ;;  %v3984_v43 = vpop.f32.mrb[23].mxu0  ;;  %v4251_v41 = vld [vmem:[%s4869_s10 + $0x24] ss:$16 sps:$4 sm:$0xff]  }
 0x296   : > { %v3990_v44 = vpop.f32.mrb[23].mxu1  ;;  %v4249_v42 = vld [vmem:[%s4869_s10 + $0x20] ss:$16 sps:$4 sm:$0xff]   ;;  %v4254_v43 = vld [vmem:[%s4869_s10 + $0x2c] ss:$16 sps:$4 sm:$0xff]   ;;  %2764 = vmatprep.subr.bf16.mxu0 %v4251_v41 }
 0x297   : > { %2337 = vxpose.xlu1.b32.start.end [1/1] (short) (narrow) %v2051_v38, 8  ;;  %v4248_v38 = vld [vmem:[%s4869_s10 + $0xc] ss:$16 sps:$4 sm:$0xff]   ;;  %2765 = vmatpush1.bf16.msra.mxu0 %v4249_v42 }
 0x298   : > { %2803 = vmatprep.subr.bf16.mxu1 %v4248_v38 }
 0x299   : > { %2804 = vmatpush1.bf16.msra.mxu1 %v4246_v37 }
 0x29a   : > { %2805 = vmatprep.subr.bf16.mxu1 %v4254_v43 }
 0x2b2   : > { %v2097_v45 = vpop.f32.mrb[24].mxu0 }
 0x2b3   : > { %v2143_v46 = vpop.f32.mrb[24].mxu1  ;;  %v3995_v47 = vpop.f32.mrb[25].mxu0  ;;  %2369 = vxpose.xlu0.b32.start.end [1/1] (short) (narrow) %v2097_v45, 8 }
 0x2b4   : > { %v4001_v48 = vpop.f32.mrb[25].mxu1  ;;  %2401 = vxpose.xlu1.b32.start.end [1/1] (short) (narrow) %v2143_v46, 8  ;;  %v2100_v49 = vpop.f32.mrb[26].mxu0  ;;  %v4252_v46 = vld [vmem:[%s4869_s10 + $0x28] ss:$16 sps:$4 sm:$0xff]  }
 0x2b5   : > { %v2146_v50 = vpop.f32.mrb[26].mxu1  ;;  %v3996_v51 = vpop.f32.mrb[27].mxu0  ;;  %2806 = vmatpush1.bf16.msra.mxu1 %v4252_v46  ;;  %v2662_v46 = vld [vmem:[#allocation2] sm:$0xff] }
 0x2b6   : > { %v4002_v52 = vpop.f32.mrb[27].mxu1  ;;  %v4255_v51 = vld [vmem:[%s4869_s10 + $0x40] ss:$16 sps:$4 sm:$0xff]  }
 0x2b7   : > { %v4257_v52 = vld [vmem:[%s4869_s10 + $0x44] ss:$16 sps:$4 sm:$0xff]  }
 0x2b8   : > { %2766 = vmatprep.subr.bf16.mxu0 %v4257_v52  ;;  %v4272_v52 = vld [vmem:[#allocation9 + $0x100] ss:$8 sps:$4 sm:$0xff] (!%p3839_p4)  }
 0x2b9   : > { %2767 = vmatpush1.bf16.msra.mxu0 %v4255_v51  ;;  %v4271_v51 = vld [vmem:[#allocation9] ss:$8 sps:$4 sm:$0xff] (!%p3839_p4)  }
 0x2ba   : > { %2768 = vmatprep.subr.bf16.mxu0 %v4263_v5  ;;  %v4295_v5 = vld [vmem:[#allocation9 + $0x40] ss:$8 sps:$4 sm:$0xff] (!%p3839_p4)  }
 0x2d2   : > { %v2189_v53 = vpop.f32.mrb[28].mxu0 }
 0x2d3   : > { %v2235_v54 = vpop.f32.mrb[28].mxu1  ;;  %2433 = vxpose.xlu0.b32.start.end [1/1] (short) (narrow) %v2189_v53, 8  ;;  %v4007_v57 = vpop.f32.mrb[29].mxu0 }
 0x2d4   : > { %v4013_v56 = vpop.f32.mrb[29].mxu1  ;;  %2465 = vxpose.xlu1.b32.start.end [1/1] (short) (narrow) %v2235_v54, 8  ;;  %v2192_v58 = vpop.f32.mrb[30].mxu0 }
 0x2d5   : > { %v2238_v59 = vpop.f32.mrb[30].mxu1  ;;  %v4008_v60 = vpop.f32.mrb[31].mxu0  ;;  %v4260_v58 = vld [vmem:[%s4869_s10 + $0x4c] ss:$16 sps:$4 sm:$0xff]  }
 0x2d6   : > { %v4014_v61 = vpop.f32.mrb[31].mxu1  ;;  %2807 = vmatprep.subr.bf16.mxu1 %v4260_v58  ;;  %v4279_v58 = vld [vmem:[#allocation9 + $0x24] ss:$8 sps:$4 sm:$0xff] (!%p3839_p4)  }
 0x2f3   : > { %v2257_v0 = vpop.trf.xlu0 }
 0x2f7   : > { %v2289_v3 = vpop.trf.xlu0 }
 0x313   : > { %v2321_v1 = vpop.trf.xlu1 }
 0x314   : > { %v2497_v10 = vcombine.low %v2257_v0, %v2321_v1  ;;  %v4258_v0 = vld [vmem:[%s4869_s10 + $0x48] ss:$16 sps:$4 sm:$0xff]  }
 0x315   : > { %2808 = vmatpush1.bf16.msra.mxu1 %v4258_v0  ;;  %v4285_v0 = vld [vmem:[#allocation9 + $0x34] ss:$8 sps:$4 sm:$0xff] (!%p3839_p4)  }
 0x316   : > { %v2504_v15 = vrot.slane %v2497_v10, %v5057_v9 }
 0x317   : > { %v2353_v4 = vpop.trf.xlu1 }
 0x318   : > { %v2505_v14 = vcombine.low %v2289_v3, %v2353_v4  ;;  %v4261_v4 = vld [vmem:[%s4869_s10 + $0x60] ss:$16 sps:$4 sm:$0xff]  }
 0x319   : > { %2769 = vmatpush1.bf16.msra.mxu0 %v4261_v4  ;;  %v4293_v4 = vld [vmem:[#allocation9 + $0x144] ss:$8 sps:$4 sm:$0xff] (!%p3839_p4)  }
 0x31a   : > { %v2512_v17 = vrot.slane %v2505_v14, %v5057_v9 }
 0x31c   : > { %v2529_v55 = vcombine.low %v2504_v15, %v2512_v17 }
 0x31e   : > { %v2536_v26 = vrot.slane %v2529_v55, %v2535_v22 }
 0x333   : > { %v2385_v7 = vpop.trf.xlu0 }
 0x334   : > { %v2417_v6 = vpop.trf.xlu1 }
 0x353   : > { %v2449_v19 = vpop.trf.xlu0 }
 0x354   : > { %v2481_v18 = vpop.trf.xlu1  ;;  %v2513_v21 = vcombine.low %v2385_v7, %v2449_v19  ;;  %v4264_v7 = vld [vmem:[%s4869_s10 + $0x68] ss:$16 sps:$4 sm:$0xff]  }
 0x355   : > { %v2521_v20 = vcombine.low %v2417_v6, %v2481_v18  ;;  %v4266_v6 = vld [vmem:[%s4869_s10 + $0x6c] ss:$16 sps:$4 sm:$0xff]  }
 0x356   : > { %v2520_v24 = vrot.slane %v2513_v21, %v5057_v9  ;;  %2809 = vmatprep.subr.bf16.mxu1 %v4266_v6  ;;  %v4296_v6 = vld [vmem:[#allocation9 + $0x140] ss:$8 sps:$4 sm:$0xff] (!%p3839_p4)  }
 0x357   : > { %v2528_v23 = vrot.slane %v2521_v20, %v5057_v9  ;;  %2810 = vmatpush1.bf16.msra.mxu1 %v4264_v7  ;;  %v4297_v7 = vld [vmem:[#allocation9 + $0x54] ss:$8 sps:$4 sm:$0xff] (!%p3839_p4)  }
 0x359   : > { %v2537_v25 = vcombine.low %v2520_v24, %v2528_v23 }
 0x35b   : > { %v2544_v27 = vrot.slane %v2537_v25, %v2535_v22 }
 0x35d   : > { %v2545_v29 = vcombine.low %v2536_v26, %v2544_v27  ;;  %v2546_v30 = vcombine.high %v2536_v26, %v2544_v27 }
 0x35f   : > { %v2549_v31 = vadd.f32 %v2548_v28, %v2545_v29  ;;  %v2550_v32 = vadd.f32 %v2548_v28, %v2546_v30 }
 0x361   : > { %v2551_v33 = vmax.f32 %v2549_v31, 0.0  ;;  %v2552_v34 = vmax.f32 %v2550_v32, 0.0 }
 0x363   : > { %v2553_v39 = vpack.c.bf16 %v2551_v33, %v2551_v33  ;;  %v2578_v40 = vpack.c.bf16 %v2552_v34, %v2552_v34 }
 0x365   : > { %v2560_v44 = vrot.slane %v2553_v39, %v5057_v9  ;;  %v2585_v45 = vrot.slane %v2578_v40, %v5057_v9 }
 0x367   : > { %v5078_v47 = vrot.slane %v2560_v44, %v2535_v22  ;;  %v5080_v48 = vrot.slane %v2585_v45, %v2535_v22  ;;  %v2561_v49 = vcombine.high %v2560_v44, %v4585_v63  ;;  %v2586_v50 = vcombine.high %v2585_v45, %v4585_v63 }
 0x369   : > { %v2606_v53 = vshrl.u32 %v5078_v47, 16  ;;  %v2607_v54 = vshrl.u32 %v5080_v48, 16  ;;  %v2576_v56 = vcombine.high %v5078_v47, %v4585_v63  ;;  %v2601_v57 = vcombine.high %v5080_v48, %v4585_v63 }
 0x36a   : > { %v2575_v59 = vrot.slane %v2561_v49, %v2535_v22  ;;  %v2600_v60 = vrot.slane %v2586_v50, %v2535_v22  ;;  %v2605_v61 = vpack.i.b16 %v5080_v48, %v5078_v47  ;;  %v4267_v49 = vld [vmem:[#allocation9 + $0x4] ss:$8 sps:$4 sm:$0xff] (!%p3839_p4)  }
 0x36b   : > { %v2608_v1 = vpack.i.b16 %v2607_v54, %v2606_v53  ;;  %v2611_v13 = vpack.i.b16 %v2601_v57, %v2576_v56  ;;  %v2612_v12 = vshrl.u32 %v2576_v56, 16  ;;  %v2613_v14 = vshrl.u32 %v2601_v57, 16  ;;  %v4269_v50 = vld [vmem:[#allocation9 + $0x104] ss:$8 sps:$4 sm:$0xff] (!%p3839_p4)   ;;  %3333 = vmatprep.subr.bf16.mxu1 (!%p3839_p4), %v4267_v49  ;;  %v4273_v53 = vld [vmem:[#allocation9 + $0x14] ss:$8 sps:$4 sm:$0xff] (!%p3839_p4)  }
 0x36c   : > { %v2577_v2 = vcombine.high %v2575_v59, %v4585_v63  ;;  %v2602_v3 = vcombine.high %v2600_v60, %v4585_v63  ;;  %v2617_v10 = vpack.i.b16 %v2600_v60, %v2575_v59  ;;  %v2618_v15 = vshrl.u32 %v2575_v59, 16  ;;  %3374 = vmatprep.subr.bf16.mxu0 (!%p3839_p4), %v4269_v50  ;;  %v4275_v54 = vld [vmem:[#allocation9 + $0x114] ss:$8 sps:$4 sm:$0xff] (!%p3839_p4)   ;;  %v4277_v56 = vld [vmem:[#allocation9 + $0x10] ss:$8 sps:$4 sm:$0xff] (!%p3839_p4)  }
 0x36d   : > { %2627 = vrot.lane.b32.xlu0 %v2608_v1, %s4588_s6  ;;  %2629 = vrot.lane.b32.xlu1 %v2611_v13, %s4589_s18  ;;  %v2614_v63 = vpack.i.b16 %v2613_v14, %v2612_v12  ;;  %v2619_v16 = vshrl.u32 %v2600_v60, 16  ;;  %v4278_v57 = vld [vmem:[#allocation9 + $0x110] ss:$8 sps:$4 sm:$0xff] (!%p3839_p4)   ;;  %v4281_v59 = vld [vmem:[#allocation9 + $0x124] ss:$8 sps:$4 sm:$0xff] (!%p3839_p4)   ;;  %s5255_s6 = sld [smem:[#allocation21_spill]] (!%p3839_p4) }
 0x36e   : > { %v2623_v11 = vpack.i.b16 %v2602_v3, %v2577_v2  ;;  %v2624_v18 = vshrl.u32 %v2577_v2, 16  ;;  %v2625_v19 = vshrl.u32 %v2602_v3, 16  ;;  %v4283_v60 = vld [vmem:[#allocation9 + $0x20] ss:$8 sps:$4 sm:$0xff] (!%p3839_p4)   ;;  %v4287_v1 = vld [vmem:[#allocation9 + $0x134] ss:$8 sps:$4 sm:$0xff] (!%p3839_p4)  }
 0x36f   : > { %v2620_v17 = vpack.i.b16 %v2619_v16, %v2618_v15  ;;  %v4289_v13 = vld [vmem:[#allocation9 + $0x30] ss:$8 sps:$4 sm:$0xff] (!%p3839_p4)   ;;  %v4291_v3 = vld [vmem:[#allocation9 + $0x44] ss:$8 sps:$4 sm:$0xff] (!%p3839_p4)   ;;  %v4307_v15 = vld [vmem:[#allocation9 + $0x60] ss:$8 sps:$4 sm:$0xff] (!%p3839_p4)  }
 0x370   : > { %v2626_v20 = vpack.i.b16 %v2625_v19, %v2624_v18  ;;  %v4290_v2 = vld [vmem:[#allocation9 + $0x130] ss:$8 sps:$4 sm:$0xff] (!%p3839_p4)   ;;  %v4303_v14 = vld [vmem:[#allocation9 + $0x64] ss:$8 sps:$4 sm:$0xff] (!%p3839_p4)   ;;  %v4308_v16 = vld [vmem:[#allocation9 + $0x160] ss:$8 sps:$4 sm:$0xff] (!%p3839_p4)  }
 0x371   : > { %2633 = vrot.lane.b32.xlu1 %v2617_v10, %s4590_s15  ;;  %2637 = vrot.lane.b32.xlu0 %v2623_v11, %s4591_s25  ;;  %v4299_v10 = vld [vmem:[#allocation9 + $0x154] ss:$8 sps:$4 sm:$0xff] (!%p3839_p4)   ;;  %v4301_v11 = vld [vmem:[#allocation9 + $0x50] ss:$8 sps:$4 sm:$0xff] (!%p3839_p4)  }
 0x372   : > { %v4302_v12 = vld [vmem:[#allocation9 + $0x150] ss:$8 sps:$4 sm:$0xff] (!%p3839_p4)   ;;  %v4311_v18 = vld [vmem:[#allocation9 + $0x174] ss:$8 sps:$4 sm:$0xff] (!%p3839_p4)  }
 0x373   : > { %v4313_v19 = vld [vmem:[#allocation9 + $0x70] ss:$8 sps:$4 sm:$0xff] (!%p3839_p4)   ;;  %v4345_v50 = vld [vmem:[#allocation9 + $0xd4] ss:$8 sps:$4 sm:$0xff] (!%p3839_p4)  }
 0x375   : > { %2631 = vrot.lane.b32.xlu1 %v2614_v63, %s4592_s23  ;;  %v4305_v63 = vld [vmem:[#allocation9 + $0x164] ss:$8 sps:$4 sm:$0xff] (!%p3839_p4)  }
 0x379   : > { %2635 = vrot.lane.b32.xlu1 %v2620_v17, %s4593_s24  ;;  %v4309_v17 = vld [vmem:[#allocation9 + $0x74] ss:$8 sps:$4 sm:$0xff] (!%p3839_p4)  }
 0x37d   : > { %2639 = vrot.lane.b32.xlu1 %v2626_v20, %s4594_s13  ;;  %v4314_v20 = vld [vmem:[#allocation9 + $0x170] ss:$8 sps:$4 sm:$0xff] (!%p3839_p4)  }
 0x3df   : > { %v2630_v21 = vpop.permute.xlu1 %2629  ;;  %v2628_v22 = vpop.permute.xlu0 %2627 }
 0x3e0   : > { %v2644_v23 = vsel %vm2641_vm2, %v2605_v61, %v2628_v22  ;;  %v4284_v61 = vld [vmem:[#allocation9 + $0x120] ss:$8 sps:$4 sm:$0xff] (!%p3839_p4)   ;;  %v4317_v22 = vld [vmem:[#allocation9 + $0x184] ss:$8 sps:$4 sm:$0xff] (!%p3839_p4)  }
 0x3e1   : > { %v2647_v24 = vsel %vm2645_vm3, %v2644_v23, %v2630_v21  ;;  %v4315_v21 = vld [vmem:[#allocation9 + $0x84] ss:$8 sps:$4 sm:$0xff] (!%p3839_p4)   ;;  %v4320_v23 = vld [vmem:[#allocation9 + $0x180] ss:$8 sps:$4 sm:$0xff] (!%p3839_p4)  }
 0x3e3   : > { %v2634_v55 = vpop.permute.xlu1 %2633  ;;  %v2638_v30 = vpop.permute.xlu0 %2637 }
 0x3e7   : > { %v2632_v25 = vpop.permute.xlu1 %2631 }
 0x3e8   : > { %v2650_v26 = vsel %vm2648_vm4, %v2647_v24, %v2632_v25  ;;  %v4321_v24 = vld [vmem:[#allocation9 + $0x94] ss:$8 sps:$4 sm:$0xff] (!%p3839_p4)  }
 0x3e9   : > { %v2652_v27 = vsel %vm1872_vm1, %v2650_v26, %v2634_v55  ;;  %v4319_v55 = vld [vmem:[#allocation9 + $0x80] ss:$8 sps:$4 sm:$0xff] (!%p3839_p4)   ;;  %v4323_v25 = vld [vmem:[#allocation9 + $0x194] ss:$8 sps:$4 sm:$0xff] (!%p3839_p4)   ;;  %v4325_v26 = vld [vmem:[#allocation9 + $0x90] ss:$8 sps:$4 sm:$0xff] (!%p3839_p4)  }
 0x3eb   : > { %v2636_v28 = vpop.permute.xlu1 %2635 }
 0x3ec   : > { %v2655_v29 = vsel %vm2653_vm5, %v2652_v27, %v2636_v28  ;;  %v4326_v27 = vld [vmem:[#allocation9 + $0x190] ss:$8 sps:$4 sm:$0xff] (!%p3839_p4)   ;;  %v4327_v28 = vld [vmem:[#allocation9 + $0xa4] ss:$8 sps:$4 sm:$0xff] (!%p3839_p4)  }
 0x3ed   : > { %v2658_v32 = vsel %vm2656_vm6, %v2655_v29, %v2638_v30  ;;  %v4329_v29 = vld [vmem:[#allocation9 + $0x1a4] ss:$8 sps:$4 sm:$0xff] (!%p3839_p4)   ;;  %v4331_v30 = vld [vmem:[#allocation9 + $0xa0] ss:$8 sps:$4 sm:$0xff] (!%p3839_p4)  }
 0x3ef   : > { %v2640_v31 = vpop.permute.xlu1 %2639 }
 0x3f0   : > { %v2661_v33 = vsel %vm2659_vm7, %v2658_v32, %v2640_v31  ;;  %v4332_v31 = vld [vmem:[#allocation9 + $0x1a0] ss:$8 sps:$4 sm:$0xff] (!%p3839_p4)   ;;  %v4333_v32 = vld [vmem:[#allocation9 + $0xb4] ss:$8 sps:$4 sm:$0xff] (!%p3839_p4)  }
 0x3f1   : > { %3837 = vmatmul.mubr.msk.bf16.vlgmr.msra.gmra.mrb[32].mxu0 %vm2759_vm8, %v2661_v33  ;;  %3838 = vmatmul.mubr.msk.bf16.vlgmr.msra.gmra.mrb[32].mxu1 %vm2759_vm8, %v2661_v33  ;;  %v2881_v33 = vsub.s32 (!%p3839_p4), 1, %v4891_v8 }
 0x3f2   : > { %3334 = vmatpush1.bf16.msra.mxu1 (!%p3839_p4), %v4271_v51  ;;  %3375 = vmatpush1.bf16.msra.mxu0 (!%p3839_p4), %v4272_v52  ;;  %v4347_v52 = vld [vmem:[#allocation9 + $0x1d4] ss:$8 sps:$4 sm:$0xff] (!%p3839_p4)  }
 0x3f3   : > { %3335 = vmatprep.subr.bf16.mxu1 (!%p3839_p4), %v4273_v53  ;;  %3376 = vmatprep.subr.bf16.mxu0 (!%p3839_p4), %v4275_v54  ;;  %v4349_v54 = vld [vmem:[#allocation9 + $0xd0] ss:$8 sps:$4 sm:$0xff] (!%p3839_p4)  }
 0x3f6   : > { %3336 = vmatpush1.bf16.msra.mxu1 (!%p3839_p4), %v4277_v56  ;;  %3377 = vmatpush1.bf16.msra.mxu0 (!%p3839_p4), %v4278_v57  ;;  %v4350_v57 = vld [vmem:[#allocation9 + $0x1d0] ss:$8 sps:$4 sm:$0xff] (!%p3839_p4)  }
 0x3f7   : > { %3337 = vmatprep.subr.bf16.mxu1 (!%p3839_p4), %v4279_v58  ;;  %3378 = vmatprep.subr.bf16.mxu0 (!%p3839_p4), %v4281_v59  ;;  %v4351_v59 = vld [vmem:[#allocation9 + $0xe4] ss:$8 sps:$4 sm:$0xff] (!%p3839_p4)  }
 0x3fa   : > { %3338 = vmatpush1.bf16.msra.mxu1 (!%p3839_p4), %v4283_v60  ;;  %3379 = vmatpush1.bf16.msra.mxu0 (!%p3839_p4), %v4284_v61  ;;  %v4353_v60 = vld [vmem:[#allocation9 + $0x1e4] ss:$8 sps:$4 sm:$0xff] (!%p3839_p4)  }
 0x3fb   : > { %3339 = vmatprep.subr.bf16.mxu1 (!%p3839_p4), %v4285_v0  ;;  %3380 = vmatprep.subr.bf16.mxu0 (!%p3839_p4), %v4287_v1  ;;  %v4355_v0 = vld [vmem:[#allocation9 + $0xe0] ss:$8 sps:$4 sm:$0xff] (!%p3839_p4)  }
 0x3fc   : > { %v4356_v1 = vld [vmem:[#allocation9 + $0x1e0] ss:$8 sps:$4 sm:$0xff] (!%p3839_p4)  }
 0x3fe   : > { %3340 = vmatpush1.bf16.msra.mxu1 (!%p3839_p4), %v4289_v13  ;;  %3381 = vmatpush1.bf16.msra.mxu0 (!%p3839_p4), %v4290_v2  ;;  %v4357_v13 = vld [vmem:[#allocation9 + $0xf4] ss:$8 sps:$4 sm:$0xff] (!%p3839_p4)  }
 0x3ff   : > { %3341 = vmatprep.subr.bf16.mxu1 (!%p3839_p4), %v4291_v3  ;;  %3382 = vmatprep.subr.bf16.mxu0 (!%p3839_p4), %v4293_v4  ;;  %v4359_v2 = vld [vmem:[#allocation9 + $0x1f4] ss:$8 sps:$4 sm:$0xff] (!%p3839_p4)  }
 0x402   : > { %3342 = vmatpush1.bf16.msra.mxu1 (!%p3839_p4), %v4295_v5  ;;  %3383 = vmatpush1.bf16.msra.mxu0 (!%p3839_p4), %v4296_v6 }
 0x403   : > { %3343 = vmatprep.subr.bf16.mxu1 (!%p3839_p4), %v4297_v7  ;;  %3384 = vmatprep.subr.bf16.mxu0 (!%p3839_p4), %v4299_v10  ;;  %v4361_v10 = vld [vmem:[#allocation9 + $0xf0] ss:$8 sps:$4 sm:$0xff] (!%p3839_p4)  }
 0x406   : > { %3344 = vmatpush1.bf16.msra.mxu1 (!%p3839_p4), %v4301_v11  ;;  %3385 = vmatpush1.bf16.msra.mxu0 (!%p3839_p4), %v4302_v12  ;;  %v4362_v11 = vld [vmem:[#allocation9 + $0x1f0] ss:$8 sps:$4 sm:$0xff] (!%p3839_p4)  }
 0x407   : > { %3345 = vmatprep.subr.bf16.mxu1 (!%p3839_p4), %v4303_v14  ;;  %3386 = vmatprep.subr.bf16.mxu0 (!%p3839_p4), %v4305_v63  ;;  %v4363_v63 = vld [vmem:[%s5254_s3 + $0x40] sm:$0xff] (!%p3839_p4)  }
 0x40a   : > { %3346 = vmatpush1.bf16.msra.mxu1 (!%p3839_p4), %v4307_v15  ;;  %3387 = vmatpush1.bf16.msra.mxu0 (!%p3839_p4), %v4308_v16 }
 0x40b   : > { %3347 = vmatprep.subr.bf16.mxu1 (!%p3839_p4), %v4309_v17  ;;  %3388 = vmatprep.subr.bf16.mxu0 (!%p3839_p4), %v4311_v18  ;;  %v4365_v18 = vld [vmem:[%s5254_s3 + $0x48] sm:$0xff] (!%p3839_p4)  }
 0x40e   : > { %3348 = vmatpush1.bf16.msra.mxu1 (!%p3839_p4), %v4313_v19  ;;  %3389 = vmatpush1.bf16.msra.mxu0 (!%p3839_p4), %v4314_v20  ;;  %v4366_v19 = vld [vmem:[%s5254_s3 + $0x8] sm:$0xff] (!%p3839_p4)   ;;  %v4367_v20 = vld [vmem:[%s5254_s3 + $0x50] sm:$0xff] (!%p3839_p4)  }
 0x40f   : > { %3349 = vmatprep.subr.bf16.mxu1 (!%p3839_p4), %v4315_v21  ;;  %3390 = vmatprep.subr.bf16.mxu0 (!%p3839_p4), %v4317_v22  ;;  %v4368_v21 = vld [vmem:[%s5254_s3 + $0x10] sm:$0xff] (!%p3839_p4)   ;;  %v4369_v22 = vld [vmem:[%s5254_s3 + $0x58] sm:$0xff] (!%p3839_p4)  }
 0x412   : > { %3350 = vmatpush1.bf16.msra.mxu1 (!%p3839_p4), %v4319_v55  ;;  %3391 = vmatpush1.bf16.msra.mxu0 (!%p3839_p4), %v4320_v23  ;;  %v4370_v55 = vld [vmem:[%s5254_s3 + $0x18] sm:$0xff] (!%p3839_p4)   ;;  %v4371_v23 = vld [vmem:[%s5254_s3 + $0x60] sm:$0xff] (!%p3839_p4)  }
 0x413   : > { %3351 = vmatprep.subr.bf16.mxu1 (!%p3839_p4), %v4321_v24  ;;  %3392 = vmatprep.subr.bf16.mxu0 (!%p3839_p4), %v4323_v25  ;;  %v4372_v24 = vld [vmem:[%s5254_s3 + $0x20] sm:$0xff] (!%p3839_p4)   ;;  %v4373_v25 = vld [vmem:[%s5254_s3 + $0x68] sm:$0xff] (!%p3839_p4)  }
 0x416   : > { %3352 = vmatpush1.bf16.msra.mxu1 (!%p3839_p4), %v4325_v26  ;;  %3393 = vmatpush1.bf16.msra.mxu0 (!%p3839_p4), %v4326_v27  ;;  %v4374_v26 = vld [vmem:[%s5254_s3 + $0x28] sm:$0xff] (!%p3839_p4)   ;;  %v4375_v27 = vld [vmem:[%s5254_s3 + $0x70] sm:$0xff] (!%p3839_p4)  }
 0x417   : > { %3353 = vmatprep.subr.bf16.mxu1 (!%p3839_p4), %v4327_v28  ;;  %3394 = vmatprep.subr.bf16.mxu0 (!%p3839_p4), %v4329_v29  ;;  %v4376_v28 = vld [vmem:[%s5254_s3 + $0x30] sm:$0xff] (!%p3839_p4)   ;;  %v4377_v29 = vld [vmem:[%s5254_s3 + $0x78] sm:$0xff] (!%p3839_p4)  }
 0x41a   : > { %3354 = vmatpush1.bf16.msra.mxu1 (!%p3839_p4), %v4331_v30  ;;  %3395 = vmatpush1.bf16.msra.mxu0 (!%p3839_p4), %v4332_v31  ;;  %v4378_v30 = vld [vmem:[%s5254_s3 + $0x38] sm:$0xff] (!%p3839_p4)   ;;  %v3001_v31 = vld [vmem:[%s5255_s6] sm:$0x3] (!%p3839_p4) }
 0x41b   : > { %3355 = vmatprep.subr.bf16.mxu1 (!%p3839_p4), %v4333_v32  ;;  %v3006_v32 = vrot.slane (!%p3839_p4), %v3001_v31, %v4996_v62 }
 0x4c4   : > { %v2796_v34 = vpop.f32.mrb[32].mxu0  ;;  %v2837_v35 = vpop.f32.mrb[32].mxu1 }
 0x4c5   : > { %v2798_v36 = vpop.f32.mrb[33].mxu0  ;;  %v2839_v37 = vpop.f32.mrb[33].mxu1 }
 0x4c6   : > { %v2848_v38 = vcombine.low %v2796_v34, %v2798_v36  ;;  %v2849_v39 = vcombine.low %v2837_v35, %v2839_v37  ;;  %v2800_v40 = vpop.f32.mrb[34].mxu0  ;;  %v2841_v41 = vpop.f32.mrb[34].mxu1  ;;  %v2885_v34 = vsub.s32 (!%p3839_p4), 2, %v4891_v8  ;;  %v4335_v35 = vld [vmem:[#allocation9 + $0x1b4] ss:$8 sps:$4 sm:$0xff] (!%p3839_p4)   ;;  %v2889_v36 = vsub.s32 (!%p3839_p4), 3, %v4891_v8 }
 0x4c7   : > { %v2801_v42 = vpop.f32.mrb[35].mxu0  ;;  %v2842_v43 = vpop.f32.mrb[35].mxu1  ;;  %v4337_v37 = vld [vmem:[#allocation9 + $0xb0] ss:$8 sps:$4 sm:$0xff] (!%p3839_p4)   ;;  %v4339_v40 = vld [vmem:[#allocation9 + $0xc4] ss:$8 sps:$4 sm:$0xff] (!%p3839_p4)   ;;  %3396 = vmatprep.subr.bf16.mxu0 (!%p3839_p4), %v4335_v35 }
 0x4c8   : > { %v2856_v44 = vrot.slane %v2848_v38, %v5057_v9  ;;  %v2863_v45 = vrot.slane %v2849_v39, %v5057_v9  ;;  %2871 = sbr.rel (%p3839_p4) target bundleno = 1691 (0x69b), region = 84  ;;  %v4338_v38 = vld [vmem:[#allocation9 + $0x1b0] ss:$8 sps:$4 sm:$0xff] (!%p3839_p4)   ;;  %3356 = vmatpush1.bf16.msra.mxu1 (!%p3839_p4), %v4337_v37 }
 0x4c9   : > { %v2873_v39 = vld [vmem:[%s5253_s22] sm:$0xf] (!%p3839_p4)  ;;  %3397 = vmatpush1.bf16.msra.mxu0 (!%p3839_p4), %v4338_v38  ;;  %3357 = vmatprep.subr.bf16.mxu1 (!%p3839_p4), %v4339_v40 }
 0x4ca   : > { %v2864_v47 = vcombine.low %v2856_v44, %v2863_v45  ;;  %v2878_v41 = vrot.slane (!%p3839_p4), %v2873_v39, %v4996_v62  ;;  %v2882_v42 = vrot.slane (!%p3839_p4), %v2873_v39, %v2881_v33  ;;  %v2886_v43 = vrot.slane (!%p3839_p4), %v2873_v39, %v2885_v34  ;;  %v4341_v44 = vld [vmem:[#allocation9 + $0x1c4] ss:$8 sps:$4 sm:$0xff] (!%p3839_p4)  }
 0x4cb   : > { %v2890_v45 = vrot.slane (!%p3839_p4), %v2873_v39, %v2889_v36  ;;  %3398 = vmatprep.subr.bf16.mxu0 (!%p3839_p4), %v4341_v44  ;;  %v3010_v34 = vrot.slane (!%p3839_p4), %v3001_v31, %v2881_v33 }
 0x4cc   : > { %v2866_v48 = vadd.f32 %v2864_v47, %v2662_v46  ;;  %v4343_v46 = vld [vmem:[#allocation9 + $0xc0] ss:$8 sps:$4 sm:$0xff] (!%p3839_p4)   ;;  %v2891_v47 = vcombine.low (!%p3839_p4), %v2878_v41, %v2882_v42 }
 0x4cd   : > { %v2892_v49 = vcombine.low (!%p3839_p4), %v2886_v43, %v2890_v45  ;;  %3358 = vmatpush1.bf16.msra.mxu1 (!%p3839_p4), %v4343_v46 }
 0x4ce   : > { %2867 = vst [vmem:[#allocation2] sm:$0xff] %v2866_v48  ;;  %v4344_v48 = vld [vmem:[#allocation9 + $0x1c0] ss:$8 sps:$4 sm:$0xff] (!%p3839_p4)   ;;  %v2899_v51 = vrot.slane (!%p3839_p4), %v2891_v47, %v5057_v9  ;;  %3359 = vmatprep.subr.bf16.mxu1 (!%p3839_p4), %v4345_v50 }
 0x4cf   : > { %v2906_v53 = vrot.slane %v2892_v49, %v5057_v9  ;;  %3399 = vmatpush1.bf16.msra.mxu0 %v4344_v48 }
 0x4d0   : > { %3400 = vmatprep.subr.bf16.mxu0 %v4347_v52 }
 0x4d1   : > { %v2907_v58 = vcombine.low %v2899_v51, %v2906_v53  ;;  %3360 = vmatpush1.bf16.msra.mxu1 %v4349_v54 }
 0x4d2   : > { %3361 = vmatprep.subr.bf16.mxu1 %v4351_v59 }
 0x4d3   : > { %3401 = vmatpush1.bf16.msra.mxu0 %v4350_v57 }
 0x4d4   : > { %3402 = vmatprep.subr.bf16.mxu0 %v4353_v60 }
 0x4d5   : > { %v2872_v56 = vld [vmem:[#allocation2] sm:$0xff]  ;;  %3362 = vmatpush1.bf16.msra.mxu1 %v4355_v0 }
 0x4d6   : > { %v2909_v61 = vadd.f32 %v2907_v58, %v2872_v56  ;;  %3363 = vmatprep.subr.bf16.mxu1 %v4357_v13 }
 0x4d7   : > { %3403 = vmatpush1.bf16.msra.mxu0 %v4356_v1 }
 0x4d8   : > { %v2910_v3 = vmax.f32 %v2909_v61, 0.0  ;;  %3404 = vmatprep.subr.bf16.mxu0 %v4359_v2 }
 0x4d9   : > { %3364 = vmatpush1.bf16.msra.mxu1 %v4361_v10 }
 0x4da   : > { %v2919_v4 = vrot.slane %v2910_v3, %v5057_v9  ;;  %v2912_v5 = vcombine.high %v2910_v3, %v2910_v3  ;;  %3945 = vmatprep.subr.bf16.mxu1 %v4363_v63 }
 0x4db   : > { %3405 = vmatpush1.bf16.msra.mxu0 %v4362_v11 }
 0x4dc   : > { %v2927_v6 = vcombine.high %v2919_v4, %v2919_v4  ;;  %v2926_v7 = vrot.slane %v2912_v5, %v5057_v9  ;;  %v2933_v16 = vpack.c.bf16 %v2919_v4, %v2919_v4  ;;  %v4364_v9 = vld [vmem:[%s5254_s3] sm:$0xff]  }
 0x4de   : > { %v2934_v12 = vpack.c.bf16 %v2927_v6, %v2927_v6  ;;  %v2928_v14 = vcombine.high %v2926_v7, %v2926_v7  ;;  %v2935_v17 = vpack.c.bf16 %v2926_v7, %v2926_v7 }
 0x4e0   : > { %3365 = vmatprep.mubr.bf16.mxu1 %v2934_v12  ;;  %v2936_v15 = vpack.c.bf16 %v2928_v14, %v2928_v14 }
 0x4e1   : > { %3366 = vmatmul.mubr.bf16.vlgmr.msra.gmra.mrb[0].mxu1 %v2933_v16 }
 0x4e2   : > { %3406 = vmatprep.mubr.bf16.mxu0 %v2936_v15  ;;  %3946 = vmatpush3.bf16.msra.mxu1 %v4364_v9 }
 0x4e3   : > { %3407 = vmatmul.mubr.bf16.vlgmr.msra.gmra.mrb[0].mxu0 %v2935_v17  ;;  %3947 = vmatprep.subr.bf16.mxu1 %v4365_v18 }
 0x4e6   : > { %3948 = vmatpush3.bf16.msra.mxu1 %v4366_v19 }
 0x4e7   : > { %3949 = vmatprep.subr.bf16.mxu1 %v4367_v20 }
 0x4ea   : > { %3950 = vmatpush3.bf16.msra.mxu1 %v4368_v21 }
 0x4eb   : > { %3951 = vmatprep.subr.bf16.mxu1 %v4369_v22 }
 0x4ee   : > { %3952 = vmatpush3.bf16.msra.mxu1 %v4370_v55 }
 0x4ef   : > { %3953 = vmatprep.subr.bf16.mxu1 %v4371_v23 }
 0x4f2   : > { %3954 = vmatpush3.bf16.msra.mxu1 %v4372_v24 }
 0x4f3   : > { %3955 = vmatprep.subr.bf16.mxu1 %v4373_v25 }
 0x4f6   : > { %3956 = vmatpush3.bf16.msra.mxu1 %v4374_v26 }
 0x4f7   : > { %3957 = vmatprep.subr.bf16.mxu1 %v4375_v27 }
 0x4fa   : > { %3958 = vmatpush3.bf16.msra.mxu1 %v4376_v28 }
 0x4fb   : > { %3959 = vmatprep.subr.bf16.mxu1 %v4377_v29 }
 0x4fe   : > { %3960 = vmatpush3.bf16.msra.mxu1 %v4378_v30 }
 0x5b4   : > { %v3367_v35 = vpop.f32.mrb[0].mxu1 }
 0x5b5   : > { %v3368_v37 = vadd.f32 %v3367_v35, %v3006_v32  ;;  %v3369_v38 = vpop.f32.mrb[1].mxu1 }
 0x5b6   : > { %v3408_v36 = vpop.f32.mrb[0].mxu0  ;;  %v3370_v40 = vadd.f32 %v3369_v38, %v3010_v34  ;;  %v3371_v41 = vpop.f32.mrb[2].mxu1 }
 0x5b7   : > { %v3410_v39 = vpop.f32.mrb[1].mxu0  ;;  %v3409_v43 = vadd.f32 %v3408_v36, %v3368_v37  ;;  %v3372_v44 = vpop.f32.mrb[3].mxu1 }
 0x5b8   : > { %v3412_v42 = vpop.f32.mrb[2].mxu0  ;;  %v3411_v46 = vadd.f32 %v3410_v39, %v3370_v40 }
 0x5b9   : > { %v3413_v45 = vpop.f32.mrb[3].mxu0  ;;  %v3415_v47 = vmax.f32 %v3409_v43, 0.0 }
 0x5ba   : > { %v3416_v48 = vmax.f32 %v3411_v46, 0.0 }
 0x5bb   : > { %v3417_v50 = vpack.c.bf16 %v3415_v47, %v3415_v47 }
 0x5bc   : > { %v3418_v49 = vpack.c.bf16 %v3416_v48, %v3416_v48 }
 0x5be   : > { %3579 = vmatprep.mubr.bf16.mxu1 %v3418_v49 }
 0x5bf   : > { %3580 = vmatmul.mubr.bf16.vlgmr.msra.gmra.mrb[4].mxu1 %v3417_v50 }
 0x692   : > { %v3961_v8 = vpop.f32.mrb[4].mxu1 }
 0x693   : > { %v3962_v62 = vpop.f32.mrb[5].mxu1 }
 0x694   : > { %v3963_v33 = vadd.f32 %v3962_v62, %v3961_v8  ;;  %v3964_v51 = vpop.f32.mrb[6].mxu1 }
 0x695   : > { %v3965_v52 = vpop.f32.mrb[7].mxu1 }
 0x696   : > { %v3587_v53 = vmax.f32 %v3963_v33, 0.0 }
 0x698   : > { %v3588_v54 = vmin.f32 %v3587_v53, 6.0 }
 0x69a   : > { %3590 = vst.msk [vmem:[#allocation11] sm:$0x3] %vm3589_vm9, %v3588_v54 }
 0x69b PF: > { %p4090_p5 = scmp.eq.s32.totalorder %s4732_s26, 3  ;;  %s4595_s18 = smov [#allocation11]  }
 0x69c   : > { %s3598_s15 = sshll.u32 %s4595_s18, 4  ;;  %s3599_s15 = int_to_ptr.vmem [resolvable:$true] %s3598_s15 }
 0x69d   : > { %s4497_s25 = scalar_lea.vmem %s3599_s15, 32  ;;  %p4504_p8 = scmp.lt.s32.totalorder %s3599_s15, %s3599_s15 }
 0x69e   : > { %p4498_p9 = scmp.ne.s32.totalorder %s3599_s15, %s4497_s25  ;;  %p4505_p10 = scmp.lt.s32.totalorder %s4497_s25, %s4497_s25 }
 0x6a0   : > { %p4499_p2 = pnand %p4498_p9, %p4090_p5  ;;  %p4506_p11 = por %p4505_p10, %p4504_p8 }
 0x6a2   : > { %p4500_p3 = pneg %p4499_p2 }
 0x6a4   : > { %p4507_p7 = pnand %p4506_p11, %p4500_p3 }
 0x6a6   : > { %4510 = shalt.err (!%p4507_p7)
}
 0x6a7   : > { %s5256_s13 = sld [smem:[#allocation23_spill]] }
 0x6ad   : > { %s5257_s11 = smov %s5256_s13  ;;  %s4511_s9 = scalar_lea.hbm %s5256_s13, 32 }
 0x6ae   : > { %p4512_p6 = scmp.ne.s32.totalorder %s5257_s11, %s4511_s9  ;;  %p4517_p13 = scmp.lt.u32.totalorder %s4511_s9, %s5257_s11 }
 0x6b0   : > { %p4513_p1 = pnand %p4512_p6, %p4090_p5 }
 0x6b2   : > { %p4514_p12 = pneg %p4513_p1 }
 0x6b4   : > { %p4519_p0 = pnand %p4517_p13, %p4514_p12 }
 0x6b6   : > { %4522 = shalt.err (!%p4519_p0)
}
 0x6b7   : > { %4070 = dma.vmem_to_hbm [thread:$0]  (%p4090_p5), %s3599_s15, 32, %s5257_s11, [#allocation5]  }
 0x6b8   : > { %4552 = dma.done.wait (%p4090_p5), [#allocation5], 32  }
 0x6b9   : > { %4554 = vsyncadd (%p4090_p5), [#allocation5], 4294967264 }
 0x6ba PF: > { %s5258_s16 = sld [smem:[#allocation17_spill]]  ;;  %s5259_s20 = sld [smem:[#allocation16_spill]] }
 0x6bb   : > { %s5260_s15 = sld [smem:[#allocation18_spill]]  ;;  %s5261_s13 = smov %s4561_s14 }
 0x6c0   : > { %p25_p4 = scmp.ge.s32.totalorder %s5258_s16, 6   ;;  %s5262_s14 = smov %s5259_s20 }
 0x6c2   :  { %27 = sbr.rel (!%p25_p4) target bundleno = 13 (0xd), region = 138 }
 0x6c9   :  { %3611 = vsyncpa [#allocation4], 1 }
 0x6ca   :  { %3613 = vsyncpa [#allocation4 + $0x1], 1 }
 0x6cb   :  { %3614 = vsyncpa [#allocation7], 1 }
 0x6cc   :  { %3616 = vsyncpa [#allocation7 + $0x1], 1 }
 0x6cd   :  { %3617 = vsyncpa [#allocation10], 1 }
 0x6ce   :  { %3618 = vsyncpa [#allocation5], 1 }
 0x6cf   :  { %3620 = vsyncpa [#allocation5 + $0x1], 1 }

</bundles_post_ra>
